<compile_context>
chip_gen: v7x
topology: tpu7x:2x2x1
jax: 0.10.0
libtpu: 0.0.40
codegen_flags: <defaults>
</compile_context>

<pallas_src>
import jax
import jax.numpy as jnp
import numpy as np
from jax.experimental import pallas as pl
from jax.experimental.pallas import tpu as pltpu


def _attention_decoder_kernel(x_ref, cw_ref, att_ref, gate_ref, outw_ref,
                              out_ref, ctx_scr, h_scr):
  f32 = jnp.float32
  B, D, S = x_ref.shape
  H = gate_ref.shape[1] // 4

  x = x_ref[...]                                                   # (B, D, S)

  # ---------- unpack packed weight slabs (static slices, read once) ---------
  wu    = att_ref[0:S, :]                                # (S, S)  U.weight^T
  wwh   = att_ref[S:S + H, :]                            # (H, S)  W rows for h
  wwc   = att_ref[S + H:S + 2 * H, :]                    # (H, S)  W rows for c
  wv    = att_ref[S + 2 * H:2 * S + 2 * H, :]            # (S, S)  V.weight^T
  b_att = att_ref[2 * S + 2 * H:2 * S + 2 * H + 1, :]    # (1, S)  bu+bw+cb*colsum(wu)
  bv    = att_ref[2 * S + 2 * H + 1:2 * S + 2 * H + 2, :]  # (1, S)

  wg_h = gate_ref[0:H, :]              # (H, 4H) folded h->gates   (i/f/o pre-halved)
  wg_c = gate_ref[H:H + D, :]          # (D, 4H) folded ctx->gates (i/f/o pre-halved)
  bg   = gate_ref[H + D:H + D + 1, :]  # (1, 4H) folded gate bias  (i/f/o pre-halved)

  # ---------- loop-invariant prelude (hoisted out of the recurrence) --------
  e  = jnp.sum(x * cw_ref[...], axis=1)                            # (B, S)
  ue = jnp.dot(e, wu, preferred_element_type=f32) + b_att          # (B, S)

  h = jnp.zeros((B, H), f32)
  c = jnp.zeros((B, H), f32)

  # ---------- fully-unrolled time recurrence (S small & static) -------------
  for t in range(S):
    # attention energies (W bias already folded into ue)
    a = jnp.maximum(
        ue + jnp.dot(h, wwh, preferred_element_type=f32)
           + jnp.dot(c, wwc, preferred_element_type=f32), 0.0)     # (B, S)
    v = jnp.dot(a, wv, preferred_element_type=f32) + bv            # (B, S)

    # softmax over time with deferred normalization (approx EUP reciprocal)
    p = jnp.exp(v - jnp.max(v, axis=-1, keepdims=True))            # (B, S)
    denom = jnp.sum(p, axis=-1, keepdims=True)                     # (B, 1)
    ctx_un = jnp.sum(x * p[:, None, :], axis=2)                    # (B, D)
    context = ctx_un * pl.reciprocal(denom, approx=True)           # (B, D)

    # folded squash_context_on_input + LSTM gates; single full-vreg tanh
    gates = (jnp.dot(context, wg_c, preferred_element_type=f32)
             + jnp.dot(h, wg_h, preferred_element_type=f32) + bg)  # (B, 4H)
    tg = jnp.tanh(gates)
    i_g = 0.5 * (tg[:, 0 * H:1 * H] + 1.0)      # sigmoid via tanh(z/2)
    f_g = 0.5 * (tg[:, 1 * H:2 * H] + 1.0)
    g_g = tg[:, 2 * H:3 * H]
    o_g = 0.5 * (tg[:, 3 * H:4 * H] + 1.0)
    c = f_g * c + i_g * g_g
    h = o_g * jnp.tanh(c)

    # stash per-step (context, h_new); output path is hoisted below
    ctx_scr[t * B:(t + 1) * B, :] = context
    h_scr[t * B:(t + 1) * B, :] = h

  # ---------- hoisted, fully-folded output path (one pass over all steps) ---
  wo_h = outw_ref[0:H, :]                       # (H, 1) = wso_h @ wout
  wo_c = outw_ref[H:H + D, :]                   # (D, 1) = wso_c @ wout
  bo   = outw_ref[H + D:H + D + 1, :]           # (1, 1) = bso @ wout + bout
  out_ref[...] = (jnp.dot(ctx_scr[...], wo_c, preferred_element_type=f32)
                  + jnp.dot(h_scr[...], wo_h, preferred_element_type=f32)
                  + bo)                                            # (S*B, 1)


@jax.jit
def attention_decoder_pallas(x, fp):
  """x: (B, input_dims, S), fp: folded/packed params -> (B, 1, S)."""
  B, D, S = x.shape
  H = fp["gate_slab"].shape[1] // 4

  out_flat = pl.pallas_call(
      _attention_decoder_kernel,
      out_shape=jax.ShapeDtypeStruct((S * B, 1), jnp.float32),
      in_specs=[pl.BlockSpec(memory_space=pltpu.MemorySpace.VMEM)] * 5,
      out_specs=pl.BlockSpec(memory_space=pltpu.MemorySpace.VMEM),
      scratch_shapes=[
          pltpu.VMEM((S * B, D), jnp.float32),   # per-step context
          pltpu.VMEM((S * B, H), jnp.float32),   # per-step h
      ],
  )(x, fp["cw"], fp["att_slab"], fp["gate_slab"], fp["out_slab"])

  # rows are ordered (t, b): assemble (B, 1, S) outside the kernel.
  return jnp.transpose(out_flat.reshape(S, B), (1, 0)).reshape(B, 1, S)


def init_attention_decoder_params(key, input_dims, sequence_length, cell_size):
  """Deterministic raw params (pre-transposed PyTorch layout)."""
  D, S, H = input_dims, sequence_length, cell_size
  ks = jax.random.split(key, 18)

  def u(k, shape, fan_in):
    b = 1.0 / np.sqrt(fan_in)
    return jax.random.uniform(k, shape, jnp.float32, -b, b)

  return {
      "cw": u(ks[0], (D, 1), D),              # Conv1d(D,1,1) weight
      "cb": u(ks[1], (1, 1), D),              # Conv1d bias
      "wu": u(ks[2], (S, S), S),              # U.weight^T
      "bu": u(ks[3], (1, S), S),
      "ww": u(ks[4], (2 * H, S), 2 * H),      # W.weight^T, rows [h | c]
      "bw": u(ks[5], (1, S), 2 * H),
      "wv": u(ks[6], (S, S), S),              # V.weight^T
      "bv": u(ks[7], (1, S), S),
      "wsi": u(ks[8], (D + H, D), D + H),     # squash_context_on_input.weight^T
      "bsi": u(ks[9], (1, D), D + H),
      "wih": u(ks[10], (D, 4 * H), H),        # LSTMCell weight_ih^T (i,f,g,o)
      "whh": u(ks[11], (H, 4 * H), H),        # LSTMCell weight_hh^T
      "bih": u(ks[12], (1, 4 * H), H),
      "bhh": u(ks[13], (1, 4 * H), H),
      "wso": u(ks[14], (D + H, H), D + H),    # squash_context_on_output.weight^T
      "bso": u(ks[15], (1, H), D + H),
      "wout": u(ks[16], (H, 1), H),           # output_linear.weight^T
      "bout": u(ks[17], (1, 1), H),
  }
  # TODO(synk): self.to_output and registerHooks are unused in forward(); not ported.


def fold_params(p):
  """One-time (init) folding + packing into the 4 kernel operands."""
  D = p["wsi"].shape[1]
  H = p["whh"].shape[0]
  S = p["wu"].shape[0]

  # --- attention slab: [wu | wwh | wwc | wv | b_att | bv] along rows --------
  # Conv bias + U bias + W bias folded into a single pre-ReLU bias.
  b_att = p["bu"] + p["bw"] + p["cb"][0, 0] * jnp.sum(p["wu"], axis=0,
                                                      keepdims=True)
  att_slab = jnp.concatenate(
      [p["wu"], p["ww"][:H], p["ww"][H:], p["wv"], b_att, p["bv"]],
      axis=0).astype(jnp.float32)                       # (2S+2H+2, S)

  # --- gate slab: squash_context_on_input folded into LSTM gates ------------
  wsi_c, wsi_h = p["wsi"][:D], p["wsi"][D:]
  a_gate = wsi_c @ p["wih"]                             # (D, 4H)
  b_gate = wsi_h @ p["wih"] + p["whh"]                  # (H, 4H)
  bias_g = p["bsi"] @ p["wih"] + p["bih"] + p["bhh"]    # (1, 4H)
  # pre-halve i/f/o columns so one tanh implements all four gate activations
  scale = jnp.concatenate(
      [jnp.full((1, H), 0.5, jnp.float32), jnp.full((1, H), 0.5, jnp.float32),
       jnp.ones((1, H), jnp.float32), jnp.full((1, H), 0.5, jnp.float32)],
      axis=1)
  gate_slab = (jnp.concatenate([b_gate, a_gate, bias_g], axis=0)
               * scale).astype(jnp.float32)             # (H+D+1, 4H)

  # --- output slab: output_linear folded into squash_context_on_output ------
  wso_c, wso_h = p["wso"][:D], p["wso"][D:]
  out_slab = jnp.concatenate(
      [wso_h @ p["wout"], wso_c @ p["wout"],
       p["bso"] @ p["wout"] + p["bout"]], axis=0).astype(jnp.float32)  # (H+D+1, 1)

  return {"cw": p["cw"].reshape(1, D, 1).astype(jnp.float32),
          "att_slab": att_slab, "gate_slab": gate_slab, "out_slab": out_slab}


# ----------------------------- pure-JAX reference -----------------------------
@jax.jit
def attention_decoder_ref(x, p):
  B, D, S = x.shape
  H = p["whh"].shape[0]

  e = jnp.sum(x * p["cw"].reshape(1, D, 1), axis=1) + p["cb"]       # (B, S)
  h = jnp.zeros((B, H), jnp.float32)
  c = jnp.zeros((B, H), jnp.float32)
  outs = []
  for _ in range(S):
    u_e = e @ p["wu"] + p["bu"]
    w_att = jnp.concatenate([h, c], axis=1) @ p["ww"] + p["bw"]
    a = jax.nn.relu(u_e + w_att)
    v = a @ p["wv"] + p["bv"]
    beta = jax.nn.softmax(v, axis=-1)
    context = jnp.sum(x * beta[:, None, :], axis=2)
    attn_in = jnp.concatenate([context, h], axis=1) @ p["wsi"] + p["bsi"]
    gates = attn_in @ p["wih"] + p["bih"] + h @ p["whh"] + p["bhh"]
    i_g = jax.nn.sigmoid(gates[:, 0 * H:1 * H])
    f_g = jax.nn.sigmoid(gates[:, 1 * H:2 * H])
    g_g = jnp.tanh(gates[:, 2 * H:3 * H])
    o_g = jax.nn.sigmoid(gates[:, 3 * H:4 * H])
    c = f_g * c + i_g * g_g
    h = o_g * jnp.tanh(c)
    out_ctx = jnp.concatenate([context, h], axis=1) @ p["wso"] + p["bso"]
    outs.append(out_ctx @ p["wout"] + p["bout"])                    # (B, 1)
  return jnp.stack(outs, axis=2)                                    # (B, 1, S)


if __name__ == "__main__":
  batch = 2
  input_dims = 4
  sequence_length = 8
  cell_size = 32

  key = jax.random.PRNGKey(0)
  kx, kp = jax.random.split(key)

  x = jax.random.normal(kx, (batch, input_dims, sequence_length), jnp.float32)
  params = init_attention_decoder_params(kp, input_dims, sequence_length,
                                         cell_size)
  folded = jax.tree_util.tree_map(jax.block_until_ready, fold_params(params))

  out = jax.block_until_ready(attention_decoder_pallas(x, folded))
  ref = jax.block_until_ready(attention_decoder_ref(x, params))

  assert out.shape == (batch, 1, sequence_length), out.shape
  # Tolerance accounts for f32 re-association of the folded linear layers,
  # the tanh-based sigmoid, and the approximate EUP reciprocal in the softmax.
  np.testing.assert_allclose(np.asarray(out), np.asarray(ref),
                             rtol=2e-3, atol=2e-3)
  print("KERNEL_OK")
</pallas_src>

<mosaic_0001>
module attributes {stable_mosaic.version = 11 : i64} {
  func.func @_attention_decoder_kernel(%arg0: memref<2x4x8xf32, #tpu.memory_space<vmem>>, %arg1: memref<1x4x1xf32, #tpu.memory_space<vmem>>, %arg2: memref<82x8xf32, #tpu.memory_space<vmem>>, %arg3: memref<37x128xf32, #tpu.memory_space<vmem>>, %arg4: memref<37x1xf32, #tpu.memory_space<vmem>>, %arg5: memref<16x1xf32, #tpu.memory_space<vmem>>, %arg6: memref<16x4xf32, #tpu.memory_space<vmem>>, %arg7: memref<16x32xf32, #tpu.memory_space<vmem>>) attributes {dimension_semantics = [], scalar_prefetch = 0 : i64, scratch_operands = 2 : i64, tpu.core_type = #tpu.core_type<tc>} {
    %c0 = arith.constant 0 : index
    %c0_0 = arith.constant 0 : index
    %c0_1 = arith.constant 0 : index
    %0 = vector.load %arg0[%c0, %c0_0, %c0_1] : memref<2x4x8xf32, #tpu.memory_space<vmem>>, vector<2x4x8xf32>
    %c0_2 = arith.constant 0 : index
    %c0_3 = arith.constant 0 : index
    %1 = vector.load %arg2[%c0_2, %c0_3] : memref<82x8xf32, #tpu.memory_space<vmem>>, vector<8x8xf32>
    %c8 = arith.constant 8 : index
    %c0_4 = arith.constant 0 : index
    %2 = vector.load %arg2[%c8, %c0_4] : memref<82x8xf32, #tpu.memory_space<vmem>>, vector<32x8xf32>
    %c40 = arith.constant 40 : index
    %c0_5 = arith.constant 0 : index
    %3 = vector.load %arg2[%c40, %c0_5] : memref<82x8xf32, #tpu.memory_space<vmem>>, vector<32x8xf32>
    %c72 = arith.constant 72 : index
    %c0_6 = arith.constant 0 : index
    %4 = vector.load %arg2[%c72, %c0_6] : memref<82x8xf32, #tpu.memory_space<vmem>>, vector<8x8xf32>
    %c80 = arith.constant 80 : index
    %c0_7 = arith.constant 0 : index
    %5 = vector.load %arg2[%c80, %c0_7] : memref<82x8xf32, #tpu.memory_space<vmem>>, vector<1x8xf32>
    %c81 = arith.constant 81 : index
    %c0_8 = arith.constant 0 : index
    %6 = vector.load %arg2[%c81, %c0_8] : memref<82x8xf32, #tpu.memory_space<vmem>>, vector<1x8xf32>
    %c0_9 = arith.constant 0 : index
    %c0_10 = arith.constant 0 : index
    %7 = vector.load %arg3[%c0_9, %c0_10] : memref<37x128xf32, #tpu.memory_space<vmem>>, vector<32x128xf32>
    %c32 = arith.constant 32 : index
    %c0_11 = arith.constant 0 : index
    %8 = vector.load %arg3[%c32, %c0_11] : memref<37x128xf32, #tpu.memory_space<vmem>>, vector<4x128xf32>
    %c36 = arith.constant 36 : index
    %c0_12 = arith.constant 0 : index
    %9 = vector.load %arg3[%c36, %c0_12] : memref<37x128xf32, #tpu.memory_space<vmem>>, vector<1x128xf32>
    %c0_13 = arith.constant 0 : index
    %c0_14 = arith.constant 0 : index
    %c0_15 = arith.constant 0 : index
    %10 = vector.load %arg1[%c0_13, %c0_14, %c0_15] : memref<1x4x1xf32, #tpu.memory_space<vmem>>, vector<1x4x1xf32>
    %11 = vector.broadcast %10 : vector<1x4x1xf32> to vector<2x4x8xf32>
    %12 = arith.mulf %0, %11 : vector<2x4x8xf32>
    %cst = arith.constant dense<0.000000e+00> : vector<2x8xf32>
    %13 = vector.multi_reduction <add>, %12, %cst [1] : vector<2x4x8xf32> to vector<2x8xf32>
    %cst_16 = arith.constant dense<0.000000e+00> : vector<2x8xf32>
    %14 = tpu.matmul %13, %1, %cst_16 {dimension_numbers = #tpu.dot_dimension_numbers<[1], [0], [0], [1], [0, 0, 1, 1], [], []>} : vector<2x8xf32>, vector<8x8xf32>, vector<2x8xf32> -> vector<2x8xf32>
    %15 = vector.broadcast %5 : vector<1x8xf32> to vector<2x8xf32>
    %16 = arith.addf %14, %15 : vector<2x8xf32>
    %cst_17 = arith.constant 0.000000e+00 : f32
    %17 = vector.broadcast %cst_17 : f32 to vector<2x32xf32>
    %cst_18 = arith.constant 0.000000e+00 : f32
    %18 = vector.broadcast %cst_18 : f32 to vector<2x32xf32>
    %cst_19 = arith.constant dense<0.000000e+00> : vector<2x8xf32>
    %19 = tpu.matmul %17, %2, %cst_19 {dimension_numbers = #tpu.dot_dimension_numbers<[1], [0], [0], [1], [0, 0, 1, 1], [], []>} : vector<2x32xf32>, vector<32x8xf32>, vector<2x8xf32> -> vector<2x8xf32>
    %20 = arith.addf %16, %19 : vector<2x8xf32>
    %cst_20 = arith.constant dense<0.000000e+00> : vector<2x8xf32>
    %21 = tpu.matmul %18, %3, %cst_20 {dimension_numbers = #tpu.dot_dimension_numbers<[1], [0], [0], [1], [0, 0, 1, 1], [], []>} : vector<2x32xf32>, vector<32x8xf32>, vector<2x8xf32> -> vector<2x8xf32>
    %22 = arith.addf %20, %21 : vector<2x8xf32>
    %cst_21 = arith.constant 0.000000e+00 : f32
    %23 = vector.broadcast %cst_21 : f32 to vector<2x8xf32>
    %24 = arith.maximumf %22, %23 : vector<2x8xf32>
    %cst_22 = arith.constant dense<0.000000e+00> : vector<2x8xf32>
    %25 = tpu.matmul %24, %4, %cst_22 {dimension_numbers = #tpu.dot_dimension_numbers<[1], [0], [0], [1], [0, 0, 1, 1], [], []>} : vector<2x8xf32>, vector<8x8xf32>, vector<2x8xf32> -> vector<2x8xf32>
    %26 = vector.broadcast %6 : vector<1x8xf32> to vector<2x8xf32>
    %27 = arith.addf %25, %26 : vector<2x8xf32>
    %cst_23 = arith.constant dense<0xFF800000> : vector<2xf32>
    %28 = vector.multi_reduction <maximumf>, %27, %cst_23 [1] : vector<2x8xf32> to vector<2xf32>
    %29 = vector.shape_cast %28 : vector<2xf32> to vector<2x1xf32>
    %30 = vector.broadcast %29 : vector<2x1xf32> to vector<2x8xf32>
    %31 = arith.subf %27, %30 : vector<2x8xf32>
    %32 = math.exp %31 : vector<2x8xf32>
    %cst_24 = arith.constant dense<0.000000e+00> : vector<2xf32>
    %33 = vector.multi_reduction <add>, %32, %cst_24 [1] : vector<2x8xf32> to vector<2xf32>
    %34 = vector.shape_cast %33 : vector<2xf32> to vector<2x1xf32>
    %35 = vector.shape_cast %32 : vector<2x8xf32> to vector<2x1x8xf32>
    %36 = vector.broadcast %35 : vector<2x1x8xf32> to vector<2x4x8xf32>
    %37 = arith.mulf %0, %36 : vector<2x4x8xf32>
    %cst_25 = arith.constant dense<0.000000e+00> : vector<2x4xf32>
    %38 = vector.multi_reduction <add>, %37, %cst_25 [2] : vector<2x4x8xf32> to vector<2x4xf32>
    %39 = tpu.reciprocal %34 {approx = true} : vector<2x1xf32> -> vector<2x1xf32>
    %40 = vector.broadcast %39 : vector<2x1xf32> to vector<2x4xf32>
    %41 = arith.mulf %38, %40 : vector<2x4xf32>
    %cst_26 = arith.constant dense<0.000000e+00> : vector<2x128xf32>
    %42 = tpu.matmul %41, %8, %cst_26 {dimension_numbers = #tpu.dot_dimension_numbers<[1], [0], [0], [1], [0, 0, 1, 1], [], []>} : vector<2x4xf32>, vector<4x128xf32>, vector<2x128xf32> -> vector<2x128xf32>
    %cst_27 = arith.constant dense<0.000000e+00> : vector<2x128xf32>
    %43 = tpu.matmul %17, %7, %cst_27 {dimension_numbers = #tpu.dot_dimension_numbers<[1], [0], [0], [1], [0, 0, 1, 1], [], []>} : vector<2x32xf32>, vector<32x128xf32>, vector<2x128xf32> -> vector<2x128xf32>
    %44 = arith.addf %42, %43 : vector<2x128xf32>
    %45 = vector.broadcast %9 : vector<1x128xf32> to vector<2x128xf32>
    %46 = arith.addf %44, %45 : vector<2x128xf32>
    %47 = math.tanh %46 : vector<2x128xf32>
    %48 = vector.extract_strided_slice %47 {offsets = [0, 0], sizes = [2, 32], strides = [1, 1]} : vector<2x128xf32> to vector<2x32xf32>
    %cst_28 = arith.constant 1.000000e+00 : f32
    %49 = vector.broadcast %cst_28 : f32 to vector<2x32xf32>
    %50 = arith.addf %48, %49 : vector<2x32xf32>
    %cst_29 = arith.constant 5.000000e-01 : f32
    %51 = vector.broadcast %cst_29 : f32 to vector<2x32xf32>
    %52 = arith.mulf %51, %50 : vector<2x32xf32>
    %53 = vector.extract_strided_slice %47 {offsets = [0, 32], sizes = [2, 32], strides = [1, 1]} : vector<2x128xf32> to vector<2x32xf32>
    %cst_30 = arith.constant 1.000000e+00 : f32
    %54 = vector.broadcast %cst_30 : f32 to vector<2x32xf32>
    %55 = arith.addf %53, %54 : vector<2x32xf32>
    %cst_31 = arith.constant 5.000000e-01 : f32
    %56 = vector.broadcast %cst_31 : f32 to vector<2x32xf32>
    %57 = arith.mulf %56, %55 : vector<2x32xf32>
    %58 = vector.extract_strided_slice %47 {offsets = [0, 64], sizes = [2, 32], strides = [1, 1]} : vector<2x128xf32> to vector<2x32xf32>
    %59 = vector.extract_strided_slice %47 {offsets = [0, 96], sizes = [2, 32], strides = [1, 1]} : vector<2x128xf32> to vector<2x32xf32>
    %cst_32 = arith.constant 1.000000e+00 : f32
    %60 = vector.broadcast %cst_32 : f32 to vector<2x32xf32>
    %61 = arith.addf %59, %60 : vector<2x32xf32>
    %cst_33 = arith.constant 5.000000e-01 : f32
    %62 = vector.broadcast %cst_33 : f32 to vector<2x32xf32>
    %63 = arith.mulf %62, %61 : vector<2x32xf32>
    %64 = arith.mulf %57, %18 : vector<2x32xf32>
    %65 = arith.mulf %52, %58 : vector<2x32xf32>
    %66 = arith.addf %64, %65 : vector<2x32xf32>
    %67 = math.tanh %66 : vector<2x32xf32>
    %68 = arith.mulf %63, %67 : vector<2x32xf32>
    %c0_34 = arith.constant 0 : index
    %c0_35 = arith.constant 0 : index
    %69 = vector.load %arg6[%c0_34, %c0_35] : memref<16x4xf32, #tpu.memory_space<vmem>>, vector<2x4xf32>
    tpu.vector_store %arg6[%c0_34, %c0_35], %41 {strides = array<i32>} : memref<16x4xf32, #tpu.memory_space<vmem>>, vector<2x4xf32>,
    %c0_36 = arith.constant 0 : index
    %c0_37 = arith.constant 0 : index
    %70 = vector.load %arg7[%c0_36, %c0_37] : memref<16x32xf32, #tpu.memory_space<vmem>>, vector<2x32xf32>
    tpu.vector_store %arg7[%c0_36, %c0_37], %68 {strides = array<i32>} : memref<16x32xf32, #tpu.memory_space<vmem>>, vector<2x32xf32>,
    %cst_38 = arith.constant dense<0.000000e+00> : vector<2x8xf32>
    %71 = tpu.matmul %68, %2, %cst_38 {dimension_numbers = #tpu.dot_dimension_numbers<[1], [0], [0], [1], [0, 0, 1, 1], [], []>} : vector<2x32xf32>, vector<32x8xf32>, vector<2x8xf32> -> vector<2x8xf32>
    %72 = arith.addf %16, %71 : vector<2x8xf32>
    %cst_39 = arith.constant dense<0.000000e+00> : vector<2x8xf32>
    %73 = tpu.matmul %66, %3, %cst_39 {dimension_numbers = #tpu.dot_dimension_numbers<[1], [0], [0], [1], [0, 0, 1, 1], [], []>} : vector<2x32xf32>, vector<32x8xf32>, vector<2x8xf32> -> vector<2x8xf32>
    %74 = arith.addf %72, %73 : vector<2x8xf32>
    %cst_40 = arith.constant 0.000000e+00 : f32
    %75 = vector.broadcast %cst_40 : f32 to vector<2x8xf32>
    %76 = arith.maximumf %74, %75 : vector<2x8xf32>
    %cst_41 = arith.constant dense<0.000000e+00> : vector<2x8xf32>
    %77 = tpu.matmul %76, %4, %cst_41 {dimension_numbers = #tpu.dot_dimension_numbers<[1], [0], [0], [1], [0, 0, 1, 1], [], []>} : vector<2x8xf32>, vector<8x8xf32>, vector<2x8xf32> -> vector<2x8xf32>
    %78 = vector.broadcast %6 : vector<1x8xf32> to vector<2x8xf32>
    %79 = arith.addf %77, %78 : vector<2x8xf32>
    %cst_42 = arith.constant dense<0xFF800000> : vector<2xf32>
    %80 = vector.multi_reduction <maximumf>, %79, %cst_42 [1] : vector<2x8xf32> to vector<2xf32>
    %81 = vector.shape_cast %80 : vector<2xf32> to vector<2x1xf32>
    %82 = vector.broadcast %81 : vector<2x1xf32> to vector<2x8xf32>
    %83 = arith.subf %79, %82 : vector<2x8xf32>
    %84 = math.exp %83 : vector<2x8xf32>
    %cst_43 = arith.constant dense<0.000000e+00> : vector<2xf32>
    %85 = vector.multi_reduction <add>, %84, %cst_43 [1] : vector<2x8xf32> to vector<2xf32>
    %86 = vector.shape_cast %85 : vector<2xf32> to vector<2x1xf32>
    %87 = vector.shape_cast %84 : vector<2x8xf32> to vector<2x1x8xf32>
    %88 = vector.broadcast %87 : vector<2x1x8xf32> to vector<2x4x8xf32>
    %89 = arith.mulf %0, %88 : vector<2x4x8xf32>
    %cst_44 = arith.constant dense<0.000000e+00> : vector<2x4xf32>
    %90 = vector.multi_reduction <add>, %89, %cst_44 [2] : vector<2x4x8xf32> to vector<2x4xf32>
    %91 = tpu.reciprocal %86 {approx = true} : vector<2x1xf32> -> vector<2x1xf32>
    %92 = vector.broadcast %91 : vector<2x1xf32> to vector<2x4xf32>
    %93 = arith.mulf %90, %92 : vector<2x4xf32>
    %cst_45 = arith.constant dense<0.000000e+00> : vector<2x128xf32>
    %94 = tpu.matmul %93, %8, %cst_45 {dimension_numbers = #tpu.dot_dimension_numbers<[1], [0], [0], [1], [0, 0, 1, 1], [], []>} : vector<2x4xf32>, vector<4x128xf32>, vector<2x128xf32> -> vector<2x128xf32>
    %cst_46 = arith.constant dense<0.000000e+00> : vector<2x128xf32>
    %95 = tpu.matmul %68, %7, %cst_46 {dimension_numbers = #tpu.dot_dimension_numbers<[1], [0], [0], [1], [0, 0, 1, 1], [], []>} : vector<2x32xf32>, vector<32x128xf32>, vector<2x128xf32> -> vector<2x128xf32>
    %96 = arith.addf %94, %95 : vector<2x128xf32>
    %97 = vector.broadcast %9 : vector<1x128xf32> to vector<2x128xf32>
    %98 = arith.addf %96, %97 : vector<2x128xf32>
    %99 = math.tanh %98 : vector<2x128xf32>
    %100 = vector.extract_strided_slice %99 {offsets = [0, 0], sizes = [2, 32], strides = [1, 1]} : vector<2x128xf32> to vector<2x32xf32>
    %cst_47 = arith.constant 1.000000e+00 : f32
    %101 = vector.broadcast %cst_47 : f32 to vector<2x32xf32>
    %102 = arith.addf %100, %101 : vector<2x32xf32>
    %cst_48 = arith.constant 5.000000e-01 : f32
    %103 = vector.broadcast %cst_48 : f32 to vector<2x32xf32>
    %104 = arith.mulf %103, %102 : vector<2x32xf32>
    %105 = vector.extract_strided_slice %99 {offsets = [0, 32], sizes = [2, 32], strides = [1, 1]} : vector<2x128xf32> to vector<2x32xf32>
    %cst_49 = arith.constant 1.000000e+00 : f32
    %106 = vector.broadcast %cst_49 : f32 to vector<2x32xf32>
    %107 = arith.addf %105, %106 : vector<2x32xf32>
    %cst_50 = arith.constant 5.000000e-01 : f32
    %108 = vector.broadcast %cst_50 : f32 to vector<2x32xf32>
    %109 = arith.mulf %108, %107 : vector<2x32xf32>
    %110 = vector.extract_strided_slice %99 {offsets = [0, 64], sizes = [2, 32], strides = [1, 1]} : vector<2x128xf32> to vector<2x32xf32>
    %111 = vector.extract_strided_slice %99 {offsets = [0, 96], sizes = [2, 32], strides = [1, 1]} : vector<2x128xf32> to vector<2x32xf32>
    %cst_51 = arith.constant 1.000000e+00 : f32
    %112 = vector.broadcast %cst_51 : f32 to vector<2x32xf32>
    %113 = arith.addf %111, %112 : vector<2x32xf32>
    %cst_52 = arith.constant 5.000000e-01 : f32
    %114 = vector.broadcast %cst_52 : f32 to vector<2x32xf32>
    %115 = arith.mulf %114, %113 : vector<2x32xf32>
    %116 = arith.mulf %109, %66 : vector<2x32xf32>
    %117 = arith.mulf %104, %110 : vector<2x32xf32>
    %118 = arith.addf %116, %117 : vector<2x32xf32>
    %119 = math.tanh %118 : vector<2x32xf32>
    %120 = arith.mulf %115, %119 : vector<2x32xf32>
    %c2 = arith.constant 2 : index
    %c0_53 = arith.constant 0 : index
    %121 = vector.load %arg6[%c2, %c0_53] : memref<16x4xf32, #tpu.memory_space<vmem>>, vector<2x4xf32>
    tpu.vector_store %arg6[%c2, %c0_53], %93 {strides = array<i32>} : memref<16x4xf32, #tpu.memory_space<vmem>>, vector<2x4xf32>,
    %c2_54 = arith.constant 2 : index
    %c0_55 = arith.constant 0 : index
    %122 = vector.load %arg7[%c2_54, %c0_55] : memref<16x32xf32, #tpu.memory_space<vmem>>, vector<2x32xf32>
    tpu.vector_store %arg7[%c2_54, %c0_55], %120 {strides = array<i32>} : memref<16x32xf32, #tpu.memory_space<vmem>>, vector<2x32xf32>,
    %cst_56 = arith.constant dense<0.000000e+00> : vector<2x8xf32>
    %123 = tpu.matmul %120, %2, %cst_56 {dimension_numbers = #tpu.dot_dimension_numbers<[1], [0], [0], [1], [0, 0, 1, 1], [], []>} : vector<2x32xf32>, vector<32x8xf32>, vector<2x8xf32> -> vector<2x8xf32>
    %124 = arith.addf %16, %123 : vector<2x8xf32>
    %cst_57 = arith.constant dense<0.000000e+00> : vector<2x8xf32>
    %125 = tpu.matmul %118, %3, %cst_57 {dimension_numbers = #tpu.dot_dimension_numbers<[1], [0], [0], [1], [0, 0, 1, 1], [], []>} : vector<2x32xf32>, vector<32x8xf32>, vector<2x8xf32> -> vector<2x8xf32>
    %126 = arith.addf %124, %125 : vector<2x8xf32>
    %cst_58 = arith.constant 0.000000e+00 : f32
    %127 = vector.broadcast %cst_58 : f32 to vector<2x8xf32>
    %128 = arith.maximumf %126, %127 : vector<2x8xf32>
    %cst_59 = arith.constant dense<0.000000e+00> : vector<2x8xf32>
    %129 = tpu.matmul %128, %4, %cst_59 {dimension_numbers = #tpu.dot_dimension_numbers<[1], [0], [0], [1], [0, 0, 1, 1], [], []>} : vector<2x8xf32>, vector<8x8xf32>, vector<2x8xf32> -> vector<2x8xf32>
    %130 = vector.broadcast %6 : vector<1x8xf32> to vector<2x8xf32>
    %131 = arith.addf %129, %130 : vector<2x8xf32>
    %cst_60 = arith.constant dense<0xFF800000> : vector<2xf32>
    %132 = vector.multi_reduction <maximumf>, %131, %cst_60 [1] : vector<2x8xf32> to vector<2xf32>
    %133 = vector.shape_cast %132 : vector<2xf32> to vector<2x1xf32>
    %134 = vector.broadcast %133 : vector<2x1xf32> to vector<2x8xf32>
    %135 = arith.subf %131, %134 : vector<2x8xf32>
    %136 = math.exp %135 : vector<2x8xf32>
    %cst_61 = arith.constant dense<0.000000e+00> : vector<2xf32>
    %137 = vector.multi_reduction <add>, %136, %cst_61 [1] : vector<2x8xf32> to vector<2xf32>
    %138 = vector.shape_cast %137 : vector<2xf32> to vector<2x1xf32>
    %139 = vector.shape_cast %136 : vector<2x8xf32> to vector<2x1x8xf32>
    %140 = vector.broadcast %139 : vector<2x1x8xf32> to vector<2x4x8xf32>
    %141 = arith.mulf %0, %140 : vector<2x4x8xf32>
    %cst_62 = arith.constant dense<0.000000e+00> : vector<2x4xf32>
    %142 = vector.multi_reduction <add>, %141, %cst_62 [2] : vector<2x4x8xf32> to vector<2x4xf32>
    %143 = tpu.reciprocal %138 {approx = true} : vector<2x1xf32> -> vector<2x1xf32>
    %144 = vector.broadcast %143 : vector<2x1xf32> to vector<2x4xf32>
    %145 = arith.mulf %142, %144 : vector<2x4xf32>
    %cst_63 = arith.constant dense<0.000000e+00> : vector<2x128xf32>
    %146 = tpu.matmul %145, %8, %cst_63 {dimension_numbers = #tpu.dot_dimension_numbers<[1], [0], [0], [1], [0, 0, 1, 1], [], []>} : vector<2x4xf32>, vector<4x128xf32>, vector<2x128xf32> -> vector<2x128xf32>
    %cst_64 = arith.constant dense<0.000000e+00> : vector<2x128xf32>
    %147 = tpu.matmul %120, %7, %cst_64 {dimension_numbers = #tpu.dot_dimension_numbers<[1], [0], [0], [1], [0, 0, 1, 1], [], []>} : vector<2x32xf32>, vector<32x128xf32>, vector<2x128xf32> -> vector<2x128xf32>
    %148 = arith.addf %146, %147 : vector<2x128xf32>
    %149 = vector.broadcast %9 : vector<1x128xf32> to vector<2x128xf32>
    %150 = arith.addf %148, %149 : vector<2x128xf32>
    %151 = math.tanh %150 : vector<2x128xf32>
    %152 = vector.extract_strided_slice %151 {offsets = [0, 0], sizes = [2, 32], strides = [1, 1]} : vector<2x128xf32> to vector<2x32xf32>
    %cst_65 = arith.constant 1.000000e+00 : f32
    %153 = vector.broadcast %cst_65 : f32 to vector<2x32xf32>
    %154 = arith.addf %152, %153 : vector<2x32xf32>
    %cst_66 = arith.constant 5.000000e-01 : f32
    %155 = vector.broadcast %cst_66 : f32 to vector<2x32xf32>
    %156 = arith.mulf %155, %154 : vector<2x32xf32>
    %157 = vector.extract_strided_slice %151 {offsets = [0, 32], sizes = [2, 32], strides = [1, 1]} : vector<2x128xf32> to vector<2x32xf32>
    %cst_67 = arith.constant 1.000000e+00 : f32
    %158 = vector.broadcast %cst_67 : f32 to vector<2x32xf32>
    %159 = arith.addf %157, %158 : vector<2x32xf32>
    %cst_68 = arith.constant 5.000000e-01 : f32
    %160 = vector.broadcast %cst_68 : f32 to vector<2x32xf32>
    %161 = arith.mulf %160, %159 : vector<2x32xf32>
    %162 = vector.extract_strided_slice %151 {offsets = [0, 64], sizes = [2, 32], strides = [1, 1]} : vector<2x128xf32> to vector<2x32xf32>
    %163 = vector.extract_strided_slice %151 {offsets = [0, 96], sizes = [2, 32], strides = [1, 1]} : vector<2x128xf32> to vector<2x32xf32>
    %cst_69 = arith.constant 1.000000e+00 : f32
    %164 = vector.broadcast %cst_69 : f32 to vector<2x32xf32>
    %165 = arith.addf %163, %164 : vector<2x32xf32>
    %cst_70 = arith.constant 5.000000e-01 : f32
    %166 = vector.broadcast %cst_70 : f32 to vector<2x32xf32>
    %167 = arith.mulf %166, %165 : vector<2x32xf32>
    %168 = arith.mulf %161, %118 : vector<2x32xf32>
    %169 = arith.mulf %156, %162 : vector<2x32xf32>
    %170 = arith.addf %168, %169 : vector<2x32xf32>
    %171 = math.tanh %170 : vector<2x32xf32>
    %172 = arith.mulf %167, %171 : vector<2x32xf32>
    %c4 = arith.constant 4 : index
    %c0_71 = arith.constant 0 : index
    %173 = vector.load %arg6[%c4, %c0_71] : memref<16x4xf32, #tpu.memory_space<vmem>>, vector<2x4xf32>
    tpu.vector_store %arg6[%c4, %c0_71], %145 {strides = array<i32>} : memref<16x4xf32, #tpu.memory_space<vmem>>, vector<2x4xf32>,
    %c4_72 = arith.constant 4 : index
    %c0_73 = arith.constant 0 : index
    %174 = vector.load %arg7[%c4_72, %c0_73] : memref<16x32xf32, #tpu.memory_space<vmem>>, vector<2x32xf32>
    tpu.vector_store %arg7[%c4_72, %c0_73], %172 {strides = array<i32>} : memref<16x32xf32, #tpu.memory_space<vmem>>, vector<2x32xf32>,
    %cst_74 = arith.constant dense<0.000000e+00> : vector<2x8xf32>
    %175 = tpu.matmul %172, %2, %cst_74 {dimension_numbers = #tpu.dot_dimension_numbers<[1], [0], [0], [1], [0, 0, 1, 1], [], []>} : vector<2x32xf32>, vector<32x8xf32>, vector<2x8xf32> -> vector<2x8xf32>
    %176 = arith.addf %16, %175 : vector<2x8xf32>
    %cst_75 = arith.constant dense<0.000000e+00> : vector<2x8xf32>
    %177 = tpu.matmul %170, %3, %cst_75 {dimension_numbers = #tpu.dot_dimension_numbers<[1], [0], [0], [1], [0, 0, 1, 1], [], []>} : vector<2x32xf32>, vector<32x8xf32>, vector<2x8xf32> -> vector<2x8xf32>
    %178 = arith.addf %176, %177 : vector<2x8xf32>
    %cst_76 = arith.constant 0.000000e+00 : f32
    %179 = vector.broadcast %cst_76 : f32 to vector<2x8xf32>
    %180 = arith.maximumf %178, %179 : vector<2x8xf32>
    %cst_77 = arith.constant dense<0.000000e+00> : vector<2x8xf32>
    %181 = tpu.matmul %180, %4, %cst_77 {dimension_numbers = #tpu.dot_dimension_numbers<[1], [0], [0], [1], [0, 0, 1, 1], [], []>} : vector<2x8xf32>, vector<8x8xf32>, vector<2x8xf32> -> vector<2x8xf32>
    %182 = vector.broadcast %6 : vector<1x8xf32> to vector<2x8xf32>
    %183 = arith.addf %181, %182 : vector<2x8xf32>
    %cst_78 = arith.constant dense<0xFF800000> : vector<2xf32>
    %184 = vector.multi_reduction <maximumf>, %183, %cst_78 [1] : vector<2x8xf32> to vector<2xf32>
    %185 = vector.shape_cast %184 : vector<2xf32> to vector<2x1xf32>
    %186 = vector.broadcast %185 : vector<2x1xf32> to vector<2x8xf32>
    %187 = arith.subf %183, %186 : vector<2x8xf32>
    %188 = math.exp %187 : vector<2x8xf32>
    %cst_79 = arith.constant dense<0.000000e+00> : vector<2xf32>
    %189 = vector.multi_reduction <add>, %188, %cst_79 [1] : vector<2x8xf32> to vector<2xf32>
    %190 = vector.shape_cast %189 : vector<2xf32> to vector<2x1xf32>
    %191 = vector.shape_cast %188 : vector<2x8xf32> to vector<2x1x8xf32>
    %192 = vector.broadcast %191 : vector<2x1x8xf32> to vector<2x4x8xf32>
    %193 = arith.mulf %0, %192 : vector<2x4x8xf32>
    %cst_80 = arith.constant dense<0.000000e+00> : vector<2x4xf32>
    %194 = vector.multi_reduction <add>, %193, %cst_80 [2] : vector<2x4x8xf32> to vector<2x4xf32>
    %195 = tpu.reciprocal %190 {approx = true} : vector<2x1xf32> -> vector<2x1xf32>
    %196 = vector.broadcast %195 : vector<2x1xf32> to vector<2x4xf32>
    %197 = arith.mulf %194, %196 : vector<2x4xf32>
    %cst_81 = arith.constant dense<0.000000e+00> : vector<2x128xf32>
    %198 = tpu.matmul %197, %8, %cst_81 {dimension_numbers = #tpu.dot_dimension_numbers<[1], [0], [0], [1], [0, 0, 1, 1], [], []>} : vector<2x4xf32>, vector<4x128xf32>, vector<2x128xf32> -> vector<2x128xf32>
    %cst_82 = arith.constant dense<0.000000e+00> : vector<2x128xf32>
    %199 = tpu.matmul %172, %7, %cst_82 {dimension_numbers = #tpu.dot_dimension_numbers<[1], [0], [0], [1], [0, 0, 1, 1], [], []>} : vector<2x32xf32>, vector<32x128xf32>, vector<2x128xf32> -> vector<2x128xf32>
    %200 = arith.addf %198, %199 : vector<2x128xf32>
    %201 = vector.broadcast %9 : vector<1x128xf32> to vector<2x128xf32>
    %202 = arith.addf %200, %201 : vector<2x128xf32>
    %203 = math.tanh %202 : vector<2x128xf32>
    %204 = vector.extract_strided_slice %203 {offsets = [0, 0], sizes = [2, 32], strides = [1, 1]} : vector<2x128xf32> to vector<2x32xf32>
    %cst_83 = arith.constant 1.000000e+00 : f32
    %205 = vector.broadcast %cst_83 : f32 to vector<2x32xf32>
    %206 = arith.addf %204, %205 : vector<2x32xf32>
    %cst_84 = arith.constant 5.000000e-01 : f32
    %207 = vector.broadcast %cst_84 : f32 to vector<2x32xf32>
    %208 = arith.mulf %207, %206 : vector<2x32xf32>
    %209 = vector.extract_strided_slice %203 {offsets = [0, 32], sizes = [2, 32], strides = [1, 1]} : vector<2x128xf32> to vector<2x32xf32>
    %cst_85 = arith.constant 1.000000e+00 : f32
    %210 = vector.broadcast %cst_85 : f32 to vector<2x32xf32>
    %211 = arith.addf %209, %210 : vector<2x32xf32>
    %cst_86 = arith.constant 5.000000e-01 : f32
    %212 = vector.broadcast %cst_86 : f32 to vector<2x32xf32>
    %213 = arith.mulf %212, %211 : vector<2x32xf32>
    %214 = vector.extract_strided_slice %203 {offsets = [0, 64], sizes = [2, 32], strides = [1, 1]} : vector<2x128xf32> to vector<2x32xf32>
    %215 = vector.extract_strided_slice %203 {offsets = [0, 96], sizes = [2, 32], strides = [1, 1]} : vector<2x128xf32> to vector<2x32xf32>
    %cst_87 = arith.constant 1.000000e+00 : f32
    %216 = vector.broadcast %cst_87 : f32 to vector<2x32xf32>
    %217 = arith.addf %215, %216 : vector<2x32xf32>
    %cst_88 = arith.constant 5.000000e-01 : f32
    %218 = vector.broadcast %cst_88 : f32 to vector<2x32xf32>
    %219 = arith.mulf %218, %217 : vector<2x32xf32>
    %220 = arith.mulf %213, %170 : vector<2x32xf32>
    %221 = arith.mulf %208, %214 : vector<2x32xf32>
    %222 = arith.addf %220, %221 : vector<2x32xf32>
    %223 = math.tanh %222 : vector<2x32xf32>
    %224 = arith.mulf %219, %223 : vector<2x32xf32>
    %c6 = arith.constant 6 : index
    %c0_89 = arith.constant 0 : index
    %225 = vector.load %arg6[%c6, %c0_89] : memref<16x4xf32, #tpu.memory_space<vmem>>, vector<2x4xf32>
    tpu.vector_store %arg6[%c6, %c0_89], %197 {strides = array<i32>} : memref<16x4xf32, #tpu.memory_space<vmem>>, vector<2x4xf32>,
    %c6_90 = arith.constant 6 : index
    %c0_91 = arith.constant 0 : index
    %226 = vector.load %arg7[%c6_90, %c0_91] : memref<16x32xf32, #tpu.memory_space<vmem>>, vector<2x32xf32>
    tpu.vector_store %arg7[%c6_90, %c0_91], %224 {strides = array<i32>} : memref<16x32xf32, #tpu.memory_space<vmem>>, vector<2x32xf32>,
    %cst_92 = arith.constant dense<0.000000e+00> : vector<2x8xf32>
    %227 = tpu.matmul %224, %2, %cst_92 {dimension_numbers = #tpu.dot_dimension_numbers<[1], [0], [0], [1], [0, 0, 1, 1], [], []>} : vector<2x32xf32>, vector<32x8xf32>, vector<2x8xf32> -> vector<2x8xf32>
    %228 = arith.addf %16, %227 : vector<2x8xf32>
    %cst_93 = arith.constant dense<0.000000e+00> : vector<2x8xf32>
    %229 = tpu.matmul %222, %3, %cst_93 {dimension_numbers = #tpu.dot_dimension_numbers<[1], [0], [0], [1], [0, 0, 1, 1], [], []>} : vector<2x32xf32>, vector<32x8xf32>, vector<2x8xf32> -> vector<2x8xf32>
    %230 = arith.addf %228, %229 : vector<2x8xf32>
    %cst_94 = arith.constant 0.000000e+00 : f32
    %231 = vector.broadcast %cst_94 : f32 to vector<2x8xf32>
    %232 = arith.maximumf %230, %231 : vector<2x8xf32>
    %cst_95 = arith.constant dense<0.000000e+00> : vector<2x8xf32>
    %233 = tpu.matmul %232, %4, %cst_95 {dimension_numbers = #tpu.dot_dimension_numbers<[1], [0], [0], [1], [0, 0, 1, 1], [], []>} : vector<2x8xf32>, vector<8x8xf32>, vector<2x8xf32> -> vector<2x8xf32>
    %234 = vector.broadcast %6 : vector<1x8xf32> to vector<2x8xf32>
    %235 = arith.addf %233, %234 : vector<2x8xf32>
    %cst_96 = arith.constant dense<0xFF800000> : vector<2xf32>
    %236 = vector.multi_reduction <maximumf>, %235, %cst_96 [1] : vector<2x8xf32> to vector<2xf32>
    %237 = vector.shape_cast %236 : vector<2xf32> to vector<2x1xf32>
    %238 = vector.broadcast %237 : vector<2x1xf32> to vector<2x8xf32>
    %239 = arith.subf %235, %238 : vector<2x8xf32>
    %240 = math.exp %239 : vector<2x8xf32>
    %cst_97 = arith.constant dense<0.000000e+00> : vector<2xf32>
    %241 = vector.multi_reduction <add>, %240, %cst_97 [1] : vector<2x8xf32> to vector<2xf32>
    %242 = vector.shape_cast %241 : vector<2xf32> to vector<2x1xf32>
    %243 = vector.shape_cast %240 : vector<2x8xf32> to vector<2x1x8xf32>
    %244 = vector.broadcast %243 : vector<2x1x8xf32> to vector<2x4x8xf32>
    %245 = arith.mulf %0, %244 : vector<2x4x8xf32>
    %cst_98 = arith.constant dense<0.000000e+00> : vector<2x4xf32>
    %246 = vector.multi_reduction <add>, %245, %cst_98 [2] : vector<2x4x8xf32> to vector<2x4xf32>
    %247 = tpu.reciprocal %242 {approx = true} : vector<2x1xf32> -> vector<2x1xf32>
    %248 = vector.broadcast %247 : vector<2x1xf32> to vector<2x4xf32>
    %249 = arith.mulf %246, %248 : vector<2x4xf32>
    %cst_99 = arith.constant dense<0.000000e+00> : vector<2x128xf32>
    %250 = tpu.matmul %249, %8, %cst_99 {dimension_numbers = #tpu.dot_dimension_numbers<[1], [0], [0], [1], [0, 0, 1, 1], [], []>} : vector<2x4xf32>, vector<4x128xf32>, vector<2x128xf32> -> vector<2x128xf32>
    %cst_100 = arith.constant dense<0.000000e+00> : vector<2x128xf32>
    %251 = tpu.matmul %224, %7, %cst_100 {dimension_numbers = #tpu.dot_dimension_numbers<[1], [0], [0], [1], [0, 0, 1, 1], [], []>} : vector<2x32xf32>, vector<32x128xf32>, vector<2x128xf32> -> vector<2x128xf32>
    %252 = arith.addf %250, %251 : vector<2x128xf32>
    %253 = vector.broadcast %9 : vector<1x128xf32> to vector<2x128xf32>
    %254 = arith.addf %252, %253 : vector<2x128xf32>
    %255 = math.tanh %254 : vector<2x128xf32>
    %256 = vector.extract_strided_slice %255 {offsets = [0, 0], sizes = [2, 32], strides = [1, 1]} : vector<2x128xf32> to vector<2x32xf32>
    %cst_101 = arith.constant 1.000000e+00 : f32
    %257 = vector.broadcast %cst_101 : f32 to vector<2x32xf32>
    %258 = arith.addf %256, %257 : vector<2x32xf32>
    %cst_102 = arith.constant 5.000000e-01 : f32
    %259 = vector.broadcast %cst_102 : f32 to vector<2x32xf32>
    %260 = arith.mulf %259, %258 : vector<2x32xf32>
    %261 = vector.extract_strided_slice %255 {offsets = [0, 32], sizes = [2, 32], strides = [1, 1]} : vector<2x128xf32> to vector<2x32xf32>
    %cst_103 = arith.constant 1.000000e+00 : f32
    %262 = vector.broadcast %cst_103 : f32 to vector<2x32xf32>
    %263 = arith.addf %261, %262 : vector<2x32xf32>
    %cst_104 = arith.constant 5.000000e-01 : f32
    %264 = vector.broadcast %cst_104 : f32 to vector<2x32xf32>
    %265 = arith.mulf %264, %263 : vector<2x32xf32>
    %266 = vector.extract_strided_slice %255 {offsets = [0, 64], sizes = [2, 32], strides = [1, 1]} : vector<2x128xf32> to vector<2x32xf32>
    %267 = vector.extract_strided_slice %255 {offsets = [0, 96], sizes = [2, 32], strides = [1, 1]} : vector<2x128xf32> to vector<2x32xf32>
    %cst_105 = arith.constant 1.000000e+00 : f32
    %268 = vector.broadcast %cst_105 : f32 to vector<2x32xf32>
    %269 = arith.addf %267, %268 : vector<2x32xf32>
    %cst_106 = arith.constant 5.000000e-01 : f32
    %270 = vector.broadcast %cst_106 : f32 to vector<2x32xf32>
    %271 = arith.mulf %270, %269 : vector<2x32xf32>
    %272 = arith.mulf %265, %222 : vector<2x32xf32>
    %273 = arith.mulf %260, %266 : vector<2x32xf32>
    %274 = arith.addf %272, %273 : vector<2x32xf32>
    %275 = math.tanh %274 : vector<2x32xf32>
    %276 = arith.mulf %271, %275 : vector<2x32xf32>
    %c8_107 = arith.constant 8 : index
    %c0_108 = arith.constant 0 : index
    %277 = vector.load %arg6[%c8_107, %c0_108] : memref<16x4xf32, #tpu.memory_space<vmem>>, vector<2x4xf32>
    tpu.vector_store %arg6[%c8_107, %c0_108], %249 {strides = array<i32>} : memref<16x4xf32, #tpu.memory_space<vmem>>, vector<2x4xf32>,
    %c8_109 = arith.constant 8 : index
    %c0_110 = arith.constant 0 : index
    %278 = vector.load %arg7[%c8_109, %c0_110] : memref<16x32xf32, #tpu.memory_space<vmem>>, vector<2x32xf32>
    tpu.vector_store %arg7[%c8_109, %c0_110], %276 {strides = array<i32>} : memref<16x32xf32, #tpu.memory_space<vmem>>, vector<2x32xf32>,
    %cst_111 = arith.constant dense<0.000000e+00> : vector<2x8xf32>
    %279 = tpu.matmul %276, %2, %cst_111 {dimension_numbers = #tpu.dot_dimension_numbers<[1], [0], [0], [1], [0, 0, 1, 1], [], []>} : vector<2x32xf32>, vector<32x8xf32>, vector<2x8xf32> -> vector<2x8xf32>
    %280 = arith.addf %16, %279 : vector<2x8xf32>
    %cst_112 = arith.constant dense<0.000000e+00> : vector<2x8xf32>
    %281 = tpu.matmul %274, %3, %cst_112 {dimension_numbers = #tpu.dot_dimension_numbers<[1], [0], [0], [1], [0, 0, 1, 1], [], []>} : vector<2x32xf32>, vector<32x8xf32>, vector<2x8xf32> -> vector<2x8xf32>
    %282 = arith.addf %280, %281 : vector<2x8xf32>
    %cst_113 = arith.constant 0.000000e+00 : f32
    %283 = vector.broadcast %cst_113 : f32 to vector<2x8xf32>
    %284 = arith.maximumf %282, %283 : vector<2x8xf32>
    %cst_114 = arith.constant dense<0.000000e+00> : vector<2x8xf32>
    %285 = tpu.matmul %284, %4, %cst_114 {dimension_numbers = #tpu.dot_dimension_numbers<[1], [0], [0], [1], [0, 0, 1, 1], [], []>} : vector<2x8xf32>, vector<8x8xf32>, vector<2x8xf32> -> vector<2x8xf32>
    %286 = vector.broadcast %6 : vector<1x8xf32> to vector<2x8xf32>
    %287 = arith.addf %285, %286 : vector<2x8xf32>
    %cst_115 = arith.constant dense<0xFF800000> : vector<2xf32>
    %288 = vector.multi_reduction <maximumf>, %287, %cst_115 [1] : vector<2x8xf32> to vector<2xf32>
    %289 = vector.shape_cast %288 : vector<2xf32> to vector<2x1xf32>
    %290 = vector.broadcast %289 : vector<2x1xf32> to vector<2x8xf32>
    %291 = arith.subf %287, %290 : vector<2x8xf32>
    %292 = math.exp %291 : vector<2x8xf32>
    %cst_116 = arith.constant dense<0.000000e+00> : vector<2xf32>
    %293 = vector.multi_reduction <add>, %292, %cst_116 [1] : vector<2x8xf32> to vector<2xf32>
    %294 = vector.shape_cast %293 : vector<2xf32> to vector<2x1xf32>
    %295 = vector.shape_cast %292 : vector<2x8xf32> to vector<2x1x8xf32>
    %296 = vector.broadcast %295 : vector<2x1x8xf32> to vector<2x4x8xf32>
    %297 = arith.mulf %0, %296 : vector<2x4x8xf32>
    %cst_117 = arith.constant dense<0.000000e+00> : vector<2x4xf32>
    %298 = vector.multi_reduction <add>, %297, %cst_117 [2] : vector<2x4x8xf32> to vector<2x4xf32>
    %299 = tpu.reciprocal %294 {approx = true} : vector<2x1xf32> -> vector<2x1xf32>
    %300 = vector.broadcast %299 : vector<2x1xf32> to vector<2x4xf32>
    %301 = arith.mulf %298, %300 : vector<2x4xf32>
    %cst_118 = arith.constant dense<0.000000e+00> : vector<2x128xf32>
    %302 = tpu.matmul %301, %8, %cst_118 {dimension_numbers = #tpu.dot_dimension_numbers<[1], [0], [0], [1], [0, 0, 1, 1], [], []>} : vector<2x4xf32>, vector<4x128xf32>, vector<2x128xf32> -> vector<2x128xf32>
    %cst_119 = arith.constant dense<0.000000e+00> : vector<2x128xf32>
    %303 = tpu.matmul %276, %7, %cst_119 {dimension_numbers = #tpu.dot_dimension_numbers<[1], [0], [0], [1], [0, 0, 1, 1], [], []>} : vector<2x32xf32>, vector<32x128xf32>, vector<2x128xf32> -> vector<2x128xf32>
    %304 = arith.addf %302, %303 : vector<2x128xf32>
    %305 = vector.broadcast %9 : vector<1x128xf32> to vector<2x128xf32>
    %306 = arith.addf %304, %305 : vector<2x128xf32>
    %307 = math.tanh %306 : vector<2x128xf32>
    %308 = vector.extract_strided_slice %307 {offsets = [0, 0], sizes = [2, 32], strides = [1, 1]} : vector<2x128xf32> to vector<2x32xf32>
    %cst_120 = arith.constant 1.000000e+00 : f32
    %309 = vector.broadcast %cst_120 : f32 to vector<2x32xf32>
    %310 = arith.addf %308, %309 : vector<2x32xf32>
    %cst_121 = arith.constant 5.000000e-01 : f32
    %311 = vector.broadcast %cst_121 : f32 to vector<2x32xf32>
    %312 = arith.mulf %311, %310 : vector<2x32xf32>
    %313 = vector.extract_strided_slice %307 {offsets = [0, 32], sizes = [2, 32], strides = [1, 1]} : vector<2x128xf32> to vector<2x32xf32>
    %cst_122 = arith.constant 1.000000e+00 : f32
    %314 = vector.broadcast %cst_122 : f32 to vector<2x32xf32>
    %315 = arith.addf %313, %314 : vector<2x32xf32>
    %cst_123 = arith.constant 5.000000e-01 : f32
    %316 = vector.broadcast %cst_123 : f32 to vector<2x32xf32>
    %317 = arith.mulf %316, %315 : vector<2x32xf32>
    %318 = vector.extract_strided_slice %307 {offsets = [0, 64], sizes = [2, 32], strides = [1, 1]} : vector<2x128xf32> to vector<2x32xf32>
    %319 = vector.extract_strided_slice %307 {offsets = [0, 96], sizes = [2, 32], strides = [1, 1]} : vector<2x128xf32> to vector<2x32xf32>
    %cst_124 = arith.constant 1.000000e+00 : f32
    %320 = vector.broadcast %cst_124 : f32 to vector<2x32xf32>
    %321 = arith.addf %319, %320 : vector<2x32xf32>
    %cst_125 = arith.constant 5.000000e-01 : f32
    %322 = vector.broadcast %cst_125 : f32 to vector<2x32xf32>
    %323 = arith.mulf %322, %321 : vector<2x32xf32>
    %324 = arith.mulf %317, %274 : vector<2x32xf32>
    %325 = arith.mulf %312, %318 : vector<2x32xf32>
    %326 = arith.addf %324, %325 : vector<2x32xf32>
    %327 = math.tanh %326 : vector<2x32xf32>
    %328 = arith.mulf %323, %327 : vector<2x32xf32>
    %c10 = arith.constant 10 : index
    %c0_126 = arith.constant 0 : index
    %329 = vector.load %arg6[%c10, %c0_126] : memref<16x4xf32, #tpu.memory_space<vmem>>, vector<2x4xf32>
    tpu.vector_store %arg6[%c10, %c0_126], %301 {strides = array<i32>} : memref<16x4xf32, #tpu.memory_space<vmem>>, vector<2x4xf32>,
    %c10_127 = arith.constant 10 : index
    %c0_128 = arith.constant 0 : index
    %330 = vector.load %arg7[%c10_127, %c0_128] : memref<16x32xf32, #tpu.memory_space<vmem>>, vector<2x32xf32>
    tpu.vector_store %arg7[%c10_127, %c0_128], %328 {strides = array<i32>} : memref<16x32xf32, #tpu.memory_space<vmem>>, vector<2x32xf32>,
    %cst_129 = arith.constant dense<0.000000e+00> : vector<2x8xf32>
    %331 = tpu.matmul %328, %2, %cst_129 {dimension_numbers = #tpu.dot_dimension_numbers<[1], [0], [0], [1], [0, 0, 1, 1], [], []>} : vector<2x32xf32>, vector<32x8xf32>, vector<2x8xf32> -> vector<2x8xf32>
    %332 = arith.addf %16, %331 : vector<2x8xf32>
    %cst_130 = arith.constant dense<0.000000e+00> : vector<2x8xf32>
    %333 = tpu.matmul %326, %3, %cst_130 {dimension_numbers = #tpu.dot_dimension_numbers<[1], [0], [0], [1], [0, 0, 1, 1], [], []>} : vector<2x32xf32>, vector<32x8xf32>, vector<2x8xf32> -> vector<2x8xf32>
    %334 = arith.addf %332, %333 : vector<2x8xf32>
    %cst_131 = arith.constant 0.000000e+00 : f32
    %335 = vector.broadcast %cst_131 : f32 to vector<2x8xf32>
    %336 = arith.maximumf %334, %335 : vector<2x8xf32>
    %cst_132 = arith.constant dense<0.000000e+00> : vector<2x8xf32>
    %337 = tpu.matmul %336, %4, %cst_132 {dimension_numbers = #tpu.dot_dimension_numbers<[1], [0], [0], [1], [0, 0, 1, 1], [], []>} : vector<2x8xf32>, vector<8x8xf32>, vector<2x8xf32> -> vector<2x8xf32>
    %338 = vector.broadcast %6 : vector<1x8xf32> to vector<2x8xf32>
    %339 = arith.addf %337, %338 : vector<2x8xf32>
    %cst_133 = arith.constant dense<0xFF800000> : vector<2xf32>
    %340 = vector.multi_reduction <maximumf>, %339, %cst_133 [1] : vector<2x8xf32> to vector<2xf32>
    %341 = vector.shape_cast %340 : vector<2xf32> to vector<2x1xf32>
    %342 = vector.broadcast %341 : vector<2x1xf32> to vector<2x8xf32>
    %343 = arith.subf %339, %342 : vector<2x8xf32>
    %344 = math.exp %343 : vector<2x8xf32>
    %cst_134 = arith.constant dense<0.000000e+00> : vector<2xf32>
    %345 = vector.multi_reduction <add>, %344, %cst_134 [1] : vector<2x8xf32> to vector<2xf32>
    %346 = vector.shape_cast %345 : vector<2xf32> to vector<2x1xf32>
    %347 = vector.shape_cast %344 : vector<2x8xf32> to vector<2x1x8xf32>
    %348 = vector.broadcast %347 : vector<2x1x8xf32> to vector<2x4x8xf32>
    %349 = arith.mulf %0, %348 : vector<2x4x8xf32>
    %cst_135 = arith.constant dense<0.000000e+00> : vector<2x4xf32>
    %350 = vector.multi_reduction <add>, %349, %cst_135 [2] : vector<2x4x8xf32> to vector<2x4xf32>
    %351 = tpu.reciprocal %346 {approx = true} : vector<2x1xf32> -> vector<2x1xf32>
    %352 = vector.broadcast %351 : vector<2x1xf32> to vector<2x4xf32>
    %353 = arith.mulf %350, %352 : vector<2x4xf32>
    %cst_136 = arith.constant dense<0.000000e+00> : vector<2x128xf32>
    %354 = tpu.matmul %353, %8, %cst_136 {dimension_numbers = #tpu.dot_dimension_numbers<[1], [0], [0], [1], [0, 0, 1, 1], [], []>} : vector<2x4xf32>, vector<4x128xf32>, vector<2x128xf32> -> vector<2x128xf32>
    %cst_137 = arith.constant dense<0.000000e+00> : vector<2x128xf32>
    %355 = tpu.matmul %328, %7, %cst_137 {dimension_numbers = #tpu.dot_dimension_numbers<[1], [0], [0], [1], [0, 0, 1, 1], [], []>} : vector<2x32xf32>, vector<32x128xf32>, vector<2x128xf32> -> vector<2x128xf32>
    %356 = arith.addf %354, %355 : vector<2x128xf32>
    %357 = vector.broadcast %9 : vector<1x128xf32> to vector<2x128xf32>
    %358 = arith.addf %356, %357 : vector<2x128xf32>
    %359 = math.tanh %358 : vector<2x128xf32>
    %360 = vector.extract_strided_slice %359 {offsets = [0, 0], sizes = [2, 32], strides = [1, 1]} : vector<2x128xf32> to vector<2x32xf32>
    %cst_138 = arith.constant 1.000000e+00 : f32
    %361 = vector.broadcast %cst_138 : f32 to vector<2x32xf32>
    %362 = arith.addf %360, %361 : vector<2x32xf32>
    %cst_139 = arith.constant 5.000000e-01 : f32
    %363 = vector.broadcast %cst_139 : f32 to vector<2x32xf32>
    %364 = arith.mulf %363, %362 : vector<2x32xf32>
    %365 = vector.extract_strided_slice %359 {offsets = [0, 32], sizes = [2, 32], strides = [1, 1]} : vector<2x128xf32> to vector<2x32xf32>
    %cst_140 = arith.constant 1.000000e+00 : f32
    %366 = vector.broadcast %cst_140 : f32 to vector<2x32xf32>
    %367 = arith.addf %365, %366 : vector<2x32xf32>
    %cst_141 = arith.constant 5.000000e-01 : f32
    %368 = vector.broadcast %cst_141 : f32 to vector<2x32xf32>
    %369 = arith.mulf %368, %367 : vector<2x32xf32>
    %370 = vector.extract_strided_slice %359 {offsets = [0, 64], sizes = [2, 32], strides = [1, 1]} : vector<2x128xf32> to vector<2x32xf32>
    %371 = vector.extract_strided_slice %359 {offsets = [0, 96], sizes = [2, 32], strides = [1, 1]} : vector<2x128xf32> to vector<2x32xf32>
    %cst_142 = arith.constant 1.000000e+00 : f32
    %372 = vector.broadcast %cst_142 : f32 to vector<2x32xf32>
    %373 = arith.addf %371, %372 : vector<2x32xf32>
    %cst_143 = arith.constant 5.000000e-01 : f32
    %374 = vector.broadcast %cst_143 : f32 to vector<2x32xf32>
    %375 = arith.mulf %374, %373 : vector<2x32xf32>
    %376 = arith.mulf %369, %326 : vector<2x32xf32>
    %377 = arith.mulf %364, %370 : vector<2x32xf32>
    %378 = arith.addf %376, %377 : vector<2x32xf32>
    %379 = math.tanh %378 : vector<2x32xf32>
    %380 = arith.mulf %375, %379 : vector<2x32xf32>
    %c12 = arith.constant 12 : index
    %c0_144 = arith.constant 0 : index
    %381 = vector.load %arg6[%c12, %c0_144] : memref<16x4xf32, #tpu.memory_space<vmem>>, vector<2x4xf32>
    tpu.vector_store %arg6[%c12, %c0_144], %353 {strides = array<i32>} : memref<16x4xf32, #tpu.memory_space<vmem>>, vector<2x4xf32>,
    %c12_145 = arith.constant 12 : index
    %c0_146 = arith.constant 0 : index
    %382 = vector.load %arg7[%c12_145, %c0_146] : memref<16x32xf32, #tpu.memory_space<vmem>>, vector<2x32xf32>
    tpu.vector_store %arg7[%c12_145, %c0_146], %380 {strides = array<i32>} : memref<16x32xf32, #tpu.memory_space<vmem>>, vector<2x32xf32>,
    %cst_147 = arith.constant dense<0.000000e+00> : vector<2x8xf32>
    %383 = tpu.matmul %380, %2, %cst_147 {dimension_numbers = #tpu.dot_dimension_numbers<[1], [0], [0], [1], [0, 0, 1, 1], [], []>} : vector<2x32xf32>, vector<32x8xf32>, vector<2x8xf32> -> vector<2x8xf32>
    %384 = arith.addf %16, %383 : vector<2x8xf32>
    %cst_148 = arith.constant dense<0.000000e+00> : vector<2x8xf32>
    %385 = tpu.matmul %378, %3, %cst_148 {dimension_numbers = #tpu.dot_dimension_numbers<[1], [0], [0], [1], [0, 0, 1, 1], [], []>} : vector<2x32xf32>, vector<32x8xf32>, vector<2x8xf32> -> vector<2x8xf32>
    %386 = arith.addf %384, %385 : vector<2x8xf32>
    %cst_149 = arith.constant 0.000000e+00 : f32
    %387 = vector.broadcast %cst_149 : f32 to vector<2x8xf32>
    %388 = arith.maximumf %386, %387 : vector<2x8xf32>
    %cst_150 = arith.constant dense<0.000000e+00> : vector<2x8xf32>
    %389 = tpu.matmul %388, %4, %cst_150 {dimension_numbers = #tpu.dot_dimension_numbers<[1], [0], [0], [1], [0, 0, 1, 1], [], []>} : vector<2x8xf32>, vector<8x8xf32>, vector<2x8xf32> -> vector<2x8xf32>
    %390 = vector.broadcast %6 : vector<1x8xf32> to vector<2x8xf32>
    %391 = arith.addf %389, %390 : vector<2x8xf32>
    %cst_151 = arith.constant dense<0xFF800000> : vector<2xf32>
    %392 = vector.multi_reduction <maximumf>, %391, %cst_151 [1] : vector<2x8xf32> to vector<2xf32>
    %393 = vector.shape_cast %392 : vector<2xf32> to vector<2x1xf32>
    %394 = vector.broadcast %393 : vector<2x1xf32> to vector<2x8xf32>
    %395 = arith.subf %391, %394 : vector<2x8xf32>
    %396 = math.exp %395 : vector<2x8xf32>
    %cst_152 = arith.constant dense<0.000000e+00> : vector<2xf32>
    %397 = vector.multi_reduction <add>, %396, %cst_152 [1] : vector<2x8xf32> to vector<2xf32>
    %398 = vector.shape_cast %397 : vector<2xf32> to vector<2x1xf32>
    %399 = vector.shape_cast %396 : vector<2x8xf32> to vector<2x1x8xf32>
    %400 = vector.broadcast %399 : vector<2x1x8xf32> to vector<2x4x8xf32>
    %401 = arith.mulf %0, %400 : vector<2x4x8xf32>
    %cst_153 = arith.constant dense<0.000000e+00> : vector<2x4xf32>
    %402 = vector.multi_reduction <add>, %401, %cst_153 [2] : vector<2x4x8xf32> to vector<2x4xf32>
    %403 = tpu.reciprocal %398 {approx = true} : vector<2x1xf32> -> vector<2x1xf32>
    %404 = vector.broadcast %403 : vector<2x1xf32> to vector<2x4xf32>
    %405 = arith.mulf %402, %404 : vector<2x4xf32>
    %cst_154 = arith.constant dense<0.000000e+00> : vector<2x128xf32>
    %406 = tpu.matmul %405, %8, %cst_154 {dimension_numbers = #tpu.dot_dimension_numbers<[1], [0], [0], [1], [0, 0, 1, 1], [], []>} : vector<2x4xf32>, vector<4x128xf32>, vector<2x128xf32> -> vector<2x128xf32>
    %cst_155 = arith.constant dense<0.000000e+00> : vector<2x128xf32>
    %407 = tpu.matmul %380, %7, %cst_155 {dimension_numbers = #tpu.dot_dimension_numbers<[1], [0], [0], [1], [0, 0, 1, 1], [], []>} : vector<2x32xf32>, vector<32x128xf32>, vector<2x128xf32> -> vector<2x128xf32>
    %408 = arith.addf %406, %407 : vector<2x128xf32>
    %409 = vector.broadcast %9 : vector<1x128xf32> to vector<2x128xf32>
    %410 = arith.addf %408, %409 : vector<2x128xf32>
    %411 = math.tanh %410 : vector<2x128xf32>
    %412 = vector.extract_strided_slice %411 {offsets = [0, 0], sizes = [2, 32], strides = [1, 1]} : vector<2x128xf32> to vector<2x32xf32>
    %cst_156 = arith.constant 1.000000e+00 : f32
    %413 = vector.broadcast %cst_156 : f32 to vector<2x32xf32>
    %414 = arith.addf %412, %413 : vector<2x32xf32>
    %cst_157 = arith.constant 5.000000e-01 : f32
    %415 = vector.broadcast %cst_157 : f32 to vector<2x32xf32>
    %416 = arith.mulf %415, %414 : vector<2x32xf32>
    %417 = vector.extract_strided_slice %411 {offsets = [0, 32], sizes = [2, 32], strides = [1, 1]} : vector<2x128xf32> to vector<2x32xf32>
    %cst_158 = arith.constant 1.000000e+00 : f32
    %418 = vector.broadcast %cst_158 : f32 to vector<2x32xf32>
    %419 = arith.addf %417, %418 : vector<2x32xf32>
    %cst_159 = arith.constant 5.000000e-01 : f32
    %420 = vector.broadcast %cst_159 : f32 to vector<2x32xf32>
    %421 = arith.mulf %420, %419 : vector<2x32xf32>
    %422 = vector.extract_strided_slice %411 {offsets = [0, 64], sizes = [2, 32], strides = [1, 1]} : vector<2x128xf32> to vector<2x32xf32>
    %423 = vector.extract_strided_slice %411 {offsets = [0, 96], sizes = [2, 32], strides = [1, 1]} : vector<2x128xf32> to vector<2x32xf32>
    %cst_160 = arith.constant 1.000000e+00 : f32
    %424 = vector.broadcast %cst_160 : f32 to vector<2x32xf32>
    %425 = arith.addf %423, %424 : vector<2x32xf32>
    %cst_161 = arith.constant 5.000000e-01 : f32
    %426 = vector.broadcast %cst_161 : f32 to vector<2x32xf32>
    %427 = arith.mulf %426, %425 : vector<2x32xf32>
    %428 = arith.mulf %421, %378 : vector<2x32xf32>
    %429 = arith.mulf %416, %422 : vector<2x32xf32>
    %430 = arith.addf %428, %429 : vector<2x32xf32>
    %431 = math.tanh %430 : vector<2x32xf32>
    %432 = arith.mulf %427, %431 : vector<2x32xf32>
    %c14 = arith.constant 14 : index
    %c0_162 = arith.constant 0 : index
    %433 = vector.load %arg6[%c14, %c0_162] : memref<16x4xf32, #tpu.memory_space<vmem>>, vector<2x4xf32>
    tpu.vector_store %arg6[%c14, %c0_162], %405 {strides = array<i32>} : memref<16x4xf32, #tpu.memory_space<vmem>>, vector<2x4xf32>,
    %c14_163 = arith.constant 14 : index
    %c0_164 = arith.constant 0 : index
    %434 = vector.load %arg7[%c14_163, %c0_164] : memref<16x32xf32, #tpu.memory_space<vmem>>, vector<2x32xf32>
    tpu.vector_store %arg7[%c14_163, %c0_164], %432 {strides = array<i32>} : memref<16x32xf32, #tpu.memory_space<vmem>>, vector<2x32xf32>,
    %c0_165 = arith.constant 0 : index
    %c0_166 = arith.constant 0 : index
    %435 = vector.load %arg4[%c0_165, %c0_166] : memref<37x1xf32, #tpu.memory_space<vmem>>, vector<32x1xf32>
    %c32_167 = arith.constant 32 : index
    %c0_168 = arith.constant 0 : index
    %436 = vector.load %arg4[%c32_167, %c0_168] : memref<37x1xf32, #tpu.memory_space<vmem>>, vector<4x1xf32>
    %c36_169 = arith.constant 36 : index
    %c0_170 = arith.constant 0 : index
    %437 = vector.load %arg4[%c36_169, %c0_170] : memref<37x1xf32, #tpu.memory_space<vmem>>, vector<1x1xf32>
    %c0_171 = arith.constant 0 : index
    %c0_172 = arith.constant 0 : index
    %438 = vector.load %arg6[%c0_171, %c0_172] : memref<16x4xf32, #tpu.memory_space<vmem>>, vector<16x4xf32>
    %cst_173 = arith.constant dense<0.000000e+00> : vector<16x1xf32>
    %439 = tpu.matmul %438, %436, %cst_173 {dimension_numbers = #tpu.dot_dimension_numbers<[1], [0], [0], [1], [0, 0, 1, 1], [], []>} : vector<16x4xf32>, vector<4x1xf32>, vector<16x1xf32> -> vector<16x1xf32>
    %c0_174 = arith.constant 0 : index
    %c0_175 = arith.constant 0 : index
    %440 = vector.load %arg7[%c0_174, %c0_175] : memref<16x32xf32, #tpu.memory_space<vmem>>, vector<16x32xf32>
    %cst_176 = arith.constant dense<0.000000e+00> : vector<16x1xf32>
    %441 = tpu.matmul %440, %435, %cst_176 {dimension_numbers = #tpu.dot_dimension_numbers<[1], [0], [0], [1], [0, 0, 1, 1], [], []>} : vector<16x32xf32>, vector<32x1xf32>, vector<16x1xf32> -> vector<16x1xf32>
    %442 = arith.addf %439, %441 : vector<16x1xf32>
    %443 = vector.broadcast %437 : vector<1x1xf32> to vector<16x1xf32>
    %444 = arith.addf %442, %443 : vector<16x1xf32>
    %c0_177 = arith.constant 0 : index
    %c0_178 = arith.constant 0 : index
    %445 = vector.load %arg5[%c0_177, %c0_178] : memref<16x1xf32, #tpu.memory_space<vmem>>, vector<16x1xf32>
    tpu.vector_store %arg5[%c0_177, %c0_178], %444 {strides = array<i32>} : memref<16x1xf32, #tpu.memory_space<vmem>>, vector<16x1xf32>,
    return
  }
}

</mosaic_0001>

<bundles_post_ra>
// kernel: attention_decoder_pallas.1
= control target key start
LH: loop header
LB: loop body
LE: loop exit
PB: predicated region body
PF: predicated region fallthrough
CT: control target
= control target key end

     0   :  { %v4980_v0 = vmov 0   ;;  %v4981_v2 = vmov 0.0|0.0   ;;  %vm4982_vm0 = vmmov 0   ;;  %v4983_v8 = vmov 0.0   ;;  %s4985_s8 = smov 64   ;;  %s4986_s9 = smov 32   ;;  %s5682_s1 = inlined_call_operand.vmem [shape: f32[1,4,1], index: 1, kind: input, shape index: {}]   ;;  %s5683_s2 = inlined_call_operand.vmem [shape: f32[82,8], index: 2, kind: input, shape index: {}]   ;;  %s5684_s0 = inlined_call_operand.vmem [shape: f32[2,4,8], index: 0, kind: input, shape index: {}]   ;;  %s5685_s3 = inlined_call_operand.vmem [shape: f32[37,128], index: 3, kind: input, shape index: {}]   ;;  %s5686_s4 = inlined_call_operand.vmem [shape: f32[37,1], index: 4, kind: input, shape index: {}]   ;;  %s5687_s5 = inlined_call_operand.vmem [shape: f32[16,1], index: 5, kind: output, shape index: {}]  }
   0x1   :  { %4908 = vset.pattern.permute.xlu0 %v4980_v0  ;;  %v40_v1 = vld [vmem:[%s5682_s1] sm:$0xf]  ;;  %4722 = vmatprep.subr.bf16.mxu1 %v4981_v2  ;;  %v23_v3 = vld [vmem:[%s5683_s2 + $0x8] sm:$0xff]  ;;  %v24_v4 = vld [vmem:[%s5683_s2 + $0x10] sm:$0xff]  ;;  %vm48_vm1 = vcmask 60416   ;;  %vm69_vm2 = vcmask 1041409   ;;  %v382_v56 = vlaneseq }
   0x2   :  { %43 = vperm.xlu0 %4908, %v40_v1   ;;  %v5028_v5 = vpack.c.bf16 %v24_v4, %v23_v3  ;;  %v25_v6 = vld [vmem:[%s5683_s2 + $0x18] sm:$0xff]  ;;  %v26_v7 = vld [vmem:[%s5683_s2 + $0x20] sm:$0xff]  ;;  %4370 = vmatprep.mubr.msk.f32.mxu1 %vm4982_vm0, %v4983_v8  ;;  %v27_v10 = vld [vmem:[%s5683_s2 + $0x28] sm:$0xff]  ;;  %vm71_vm3 = vcmask 64512   ;;  %vm368_vm4 = vcmask 58368   ;;  %vm525_vm5 = vcmask 1043456  }
   0x3   :  { %4357 = vmatprep.subr.mxu0 %v4983_v8  ;;  %4359 = vmatprep.mubr.msk.f32.mxu0 %vm4982_vm0, %v4983_v8  ;;  %v5042_v9 = vpack.c.bf16 %v26_v7, %v25_v6  ;;  %v28_v11 = vld [vmem:[%s5683_s2 + $0x30] sm:$0xff]  ;;  %v29_v13 = vld [vmem:[%s5683_s2 + $0x38] sm:$0xff]  ;;  %v30_v14 = vld [vmem:[%s5683_s2 + $0x40] sm:$0xff]  ;;  %v4984_v54 = vmov 1966171168   ;;  %v383_v58 = vshrl.u32 %v382_v56, 7 }
   0x4   :  { %4724 = vmatpush3.bf16.msra.mxu1 %v5028_v5  ;;  %4909 = vset.pattern.permute.xlu1 %v4980_v0  ;;  %v5052_v12 = vpack.c.bf16 %v28_v11, %v27_v10  ;;  %v5063_v15 = vpack.c.bf16 %v30_v14, %v29_v13  ;;  %v22_v16 = vld [vmem:[%s5683_s2] sm:$0xff]  ;;  %v5102_v38 = vld [vmem:[%s5683_s2 + $0x48] sm:$0xff]  ;;  %v4139_v40 = vld [vmem:[%s5683_s2 + $0x50] ss:$0 sm:$0xff]  ;;  %v380_v55 = vunpack.c.l.s4 %v4984_v54  ;;  %vm625_vm6 = vcmask 25600   ;;  %s4987_s10 = smov 96  }
   0x5   :  { %4725 = vmatprep.subr.bf16.mxu1 %v4981_v2  ;;  %4358 = vmatpush3.msra.mxu0 %v22_v16  ;;  %v5084_v17 = vld [vmem:[%s5684_s0] sm:$0xf]  ;;  %v5089_v18 = vld [vmem:[%s5684_s0 + $0x4] sm:$0xf]  ;;  %v5118_v46 = vld [vmem:[%s5683_s2 + $0x51] ss:$0 sm:$0xff] }
   0x6   :  { %4384 = vmatprep.subr.mxu0 %v4983_v8  ;;  %v381_v57 = vunpack.c.0.s8 %v380_v55  ;;  %v5126_v63 = vsub.s32 0, %v383_v58  ;;  %v34_v14 = vld [vmem:[%s5685_s3] sm:$0xff]  ;;  %v35_v16 = vld [vmem:[%s5685_s3 + $0x8] sm:$0xff]  ;;  %vm522_vm7 = vcmask 31744   ;;  %vm631_vm8 = vcmask 254976  }
   0x7   :  { %vm144_vm9 = vcmask 261120   ;;  %vm4132_vm10 = vcmask 7168  }
   0x8   :  { %4727 = vmatpush3.bf16.msra.mxu1 %v5042_v9  ;;  %v5122_v59 = vsub.s32 %v381_v57, %v383_v58 }
   0x9   :  { %4728 = vmatprep.subr.bf16.mxu1 %v4981_v2 }
   0xb   :  { %4371 = vmatmul.mubr.f32.vlgmr.msra.gmra.mrb[0].mxu1 %v4983_v8 }
   0xc   :  { %4730 = vmatpush3.bf16.msra.mxu1 %v5052_v12  ;;  %4381 = vmatprep.mubr.msk.f32.mxu1 %vm4982_vm0, %v4983_v8 }
   0xd   :  { %4731 = vmatprep.subr.bf16.mxu1 %v4981_v2 }
  0x10   :  { %4733 = vmatpush3.bf16.msra.mxu1 %v5063_v15 }
  0x11   :  { %4740 = vmatprep.subr.bf16.mxu1 %v4981_v2 }
  0x13   :  { %4382 = vmatmul.mubr.f32.vlgmr.msra.gmra.mrb[0].mxu1 %v4983_v8 }
  0x14   :  { %4742 = vmatpush3.bf16.msra.mxu1 %v5028_v5  ;;  %4413 = vmatprep.mubr.msk.f32.mxu1 %vm4982_vm0, %v4983_v8 }
  0x15   :  { %4743 = vmatprep.subr.bf16.mxu1 %v4981_v2 }
  0x18   :  { %4745 = vmatpush3.bf16.msra.mxu1 %v5042_v9 }
  0x19   :  { %4746 = vmatprep.subr.bf16.mxu1 %v4981_v2 }
  0x81   :  { %v44_v19 = vpop.permute.xlu0 %43 }
  0x82   :  { %v46_v20 = vmul.f32 %v44_v19, %v5084_v17  ;;  %v47_v21 = vmul.f32 %v44_v19, %v5089_v18  ;;  %v36_v19 = vld [vmem:[%s5685_s3 + $0x10] sm:$0xff] }
  0x84   :  { %v49_v22 = vsel %vm48_vm1, %v46_v20, 0.0  ;;  %v56_v23 = vsel %vm48_vm1, %v47_v21, 0.0  ;;  %v5145_v20 = vpack.c.bf16 %v35_v16, %v34_v14  ;;  %v37_v21 = vld [vmem:[%s5685_s3 + $0x18] sm:$0xff] }
  0x85   :  { %v50_v24 = vrot.slane %v49_v22, 4  ;;  %v57_v25 = vrot.slane %v56_v23, 4 }
  0x87   :  { %v51_v26 = vadd.f32 %v50_v24, %v49_v22  ;;  %v58_v27 = vadd.f32 %v57_v25, %v56_v23  ;;  %v5151_v22 = vpack.c.bf16 %v37_v21, %v36_v19  ;;  %v5159_v25 = vsub.s32 1, %v383_v58 }
  0x89   :  { %v52_v28 = vrot.slane %v51_v26, 2  ;;  %v59_v29 = vrot.slane %v58_v27, 2 }
  0x8b   :  { %v53_v30 = vadd.f32 %v52_v28, %v51_v26  ;;  %v60_v31 = vadd.f32 %v59_v29, %v58_v27 }
  0x8d   :  { %v54_v32 = vrot.slane %v53_v30, 1  ;;  %v61_v33 = vrot.slane %v60_v31, 1 }
  0x8f   :  { %v55_v34 = vadd.f32 %v54_v32, %v53_v30  ;;  %v62_v35 = vadd.f32 %v61_v33, %v60_v31  ;;  %v5166_v31 = vld [vmem:[%s5685_s3 + $0x20] sm:$0xf] }
  0x91   :  { %v70_v36 = vsel %vm69_vm2, %v62_v35, %v55_v34  ;;  %v512_v35 = vand.u32 127, %v382_v56 }
  0x92   :  { %4360 = vmatmul.mubr.msk.f32.vlgmr.msra.gmra.mrb[0].mxu0 %vm71_vm3, %v70_v36 }
  0x93   :  { %4386 = vmatprep.mubr.msk.f32.mxu0 %vm4982_vm0, %v4983_v8  ;;  %4385 = vmatpush3.msra.mxu0 %v5102_v38 }
  0x94   :  { %4734 = vmatprep.subr.bf16.mxu0 %v4981_v2 }
  0xe6   :  { %v285_v37 = vpop.f32.mrb[0].mxu1 }
  0xe7   :  { %v4383_v39 = vpop.f32.mrb[1].mxu1 }
 0x165   :  { %v140_v41 = vpop.f32.mrb[0].mxu0 }
 0x166   :  { %v5109_v42 = vadd.f32 %v4139_v40, %v140_v41  ;;  %v4361_v43 = vpop.f32.mrb[1].mxu0 }
 0x168   :  { %v4874_v44 = vadd.f32 %v285_v37, %v5109_v42  ;;  %v5171_v37 = vsub.s32 %v512_v35, %v383_v58 }
 0x16a   :  { %v290_v45 = vmax.f32 %v4874_v44, 0.0  ;;  %v5185_v44 = vld [vmem:[%s5685_s3 + $0x24] ss:$0 sm:$0xff] }
 0x16c   :  { %4387 = vmatmul.mubr.msk.f32.vlgmr.msra.gmra.mrb[2].mxu0 %vm71_vm3, %v290_v45 }
 0x16d   :  { %4397 = vmatprep.mubr.msk.f32.mxu0 %vm4982_vm0, %v4983_v8  ;;  %4736 = vmatpush3.bf16.msra.mxu0 %v5145_v20 }
 0x16e   :  { %4737 = vmatprep.subr.bf16.mxu0 %v4981_v2 }
 0x171   :  { %4739 = vmatpush3.bf16.msra.mxu0 %v5151_v22 }
 0x172   :  { %4400 = vmatprep.subr.mxu0 %v4983_v8 }
 0x174   :  { %4398 = vmatmul.mubr.f32.vlgmr.msra.gmra.mrb[4].mxu0 %v4983_v8 }
 0x175   :  { %4402 = vmatprep.mubr.msk.f32.mxu0 %vm4982_vm0, %v4983_v8  ;;  %4401 = vmatpush3.msk.msra.mxu0 %vm525_vm5, %v5166_v31 }
 0x176   :  { %4427 = vmatprep.subr.mxu0 %v4983_v8 }
 0x23f   :  { %v364_v47 = vpop.f32.mrb[2].mxu0 }
 0x240   :  { %v365_v48 = vadd.f32 %v5118_v46, %v364_v47  ;;  %v4388_v49 = vpop.f32.mrb[3].mxu0 }
 0x242   :  { %v369_v50 = vsel %vm368_vm4, %v365_v48, -inf }
 0x243   :  { %370 = vmax.xlane.f32.xlu0 %v369_v50 }
 0x247   :  { %v499_v33 = vpop.f32.mrb[4].mxu0 }
 0x248   :  { %v4399_v34 = vpop.f32.mrb[5].mxu0 }
 0x2d0   :  { %v371_v51 = vpop.xlane.xlu0 %370 }
 0x2d1   :  { %v372_v52 = vsub.f32 %v365_v48, %v371_v51 }
 0x2d3   :  { %v373_v53 = vmul.f32 1.442695, %v372_v52 }
 0x2d5   :  { %4910 = vpow2.f32 %v373_v53 }
 0x2df   :  { %v4911_v60 = vpop.eup %4910 }
 0x2e0   :  { %v375_v61 = vsel %vm368_vm4, %v4911_v60, 0.0  ;;  %v385_v62 = vrot.slane %v4911_v60, %v5122_v59 }
 0x2e1   :  { %376 = vadd.xlane.f32.xlu1 %v375_v61 }
 0x2e2   :  { %v393_v0 = vrot.slane %v385_v62, %v5122_v59  ;;  %v386_v1 = vcombine.high %v385_v62, %v385_v62 }
 0x2e4   :  { %v404_v3 = vrot.slane %v393_v0, %v5126_v63  ;;  %v400_v4 = vrot.slane %v386_v1, %v5122_v59 }
 0x2e6   :  { %v411_v6 = vmul.f32 %v404_v3, %v5084_v17  ;;  %v408_v7 = vrot.slane %v400_v4, %v5126_v63 }
 0x2e8   :  { %v413_v10 = vsel %vm48_vm1, %v411_v6, 0.0  ;;  %v412_v11 = vmul.f32 %v408_v7, %v5089_v18 }
 0x2e9   :  { %414 = vadd.xlane.f32.xlu1 %v413_v10 }
 0x2ea   :  { %v416_v13 = vsel %vm48_vm1, %v412_v11, 0.0 }
 0x2ed   :  { %417 = vadd.xlane.f32.xlu1 %v416_v13 }
 0x36e   :  { %v377_v23 = vpop.xlane.xlu1 %376 }
 0x36f   :  { %4912 = vrcp.f32 %v377_v23 }
 0x376   :  { %v415_v24 = vpop.xlane.xlu1 %414 }
 0x379   :  { %v4913_v26 = vpop.eup %4912 }
 0x37a   :  { %v424_v27 = vrot.slane %v4913_v26, %v5126_v63  ;;  %v428_v29 = vrot.slane %v4913_v26, %v5159_v25  ;;  %v418_v30 = vpop.xlane.xlu1 %417 }
 0x37c   :  { %v431_v28 = vmul.f32 %v424_v27, %v415_v24  ;;  %v432_v32 = vmul.f32 %v428_v29, %v418_v30 }
 0x37e   :  { %506 = vperm.xlu1 %4909, %v431_v28  }
 0x382   :  { %509 = vperm.xlu1 %4909, %v432_v32  }
 0x3fd   :  { %v507_v36 = vpop.permute.xlu1 %506 }
 0x3fe   :  { %v516_v40 = vrot.slane %v507_v36, %v5171_v37 }
 0x401   :  { %v510_v39 = vpop.permute.xlu1 %509 }
 0x402   :  { %v520_v41 = vrot.slane %v510_v39, %v5171_v37 }
 0x404   :  { %v521_v43 = vsel %vm69_vm2, %v520_v41, %v516_v40 }
 0x405   :  { %626 = vst.msk [vmem:[#allocation2] sm:$0x3] %vm625_vm6, %v521_v43  ;;  %4403 = vmatmul.mubr.msk.f32.vlgmr.msra.gmra.mrb[6].mxu0 %vm522_vm7, %v521_v43 }
 0x406   :  { %4428 = vmatpush3.msra.mxu0 %v5102_v38  ;;  %4429 = vmatprep.mubr.msk.f32.mxu0 %vm4982_vm0, %v4983_v8 }
 0x407   :  { %4752 = vmatprep.subr.bf16.mxu0 %v4981_v2 }
 0x4d8   :  { %v595_v45 = vpop.f32.mrb[6].mxu0 }
 0x4d9   :  { %v596_v47 = vadd.f32 %v595_v45, %v499_v33  ;;  %v4404_v48 = vpop.f32.mrb[7].mxu0 }
 0x4db   :  { %v603_v49 = vadd.f32 %v5185_v44, %v596_v47 }
 0x4dd   :  { %4914 = vtanh.f32 %v603_v49 }
 0x4e7   :  { %v4915_v50 = vpop.eup %4914 }
 0x4e8   :  { %609 = vrot.lane.b32.xlu1 %v4915_v50, %s4985_s8  ;;  %v605_v51 = vadd.f32 1.0, %v4915_v50 }
 0x4ea   :  { %v606_v52 = vmul.f32 0.5, %v605_v51 }
 0x4ec   :  { %v607_v55 = vmul.f32 0.0, %v606_v52 }
 0x55a   :  { %v610_v53 = vpop.permute.xlu1 %609 }
 0x55b   :  { %v612_v54 = vmul.f32 %v610_v53, %v606_v52 }
 0x55d   :  { %614 = vrot.lane.b32.xlu0 %v612_v54, %s4986_s9 }
 0x5cf   :  { %v615_v56 = vpop.permute.xlu0 %614 }
 0x5d0   :  { %v5190_v57 = vadd.f32 %v615_v56, %v607_v55 }
 0x5d2   :  { %4916 = vtanh.f32 %v5190_v57 }
 0x5dc   :  { %v4917_v58 = vpop.eup %4916 }
 0x5dd   :  { %620 = vrot.lane.b32.xlu1 %v4917_v58, %s4985_s8 }
 0x64f   :  { %v621_v60 = vpop.permute.xlu1 %620 }
 0x650   :  { %v623_v61 = vmul.f32 %v621_v60, %v606_v52 }
 0x652   :  { %628 = vrot.lane.b32.xlu1 %v623_v61, %s4986_s9 }
 0x656   :  { %707 = vrot.lane.b32.xlu1 %v5190_v57, %s4987_s10 }
 0x6c4   :  { %v629_v62 = vpop.permute.xlu1 %628 }
 0x6c5   :  { %632 = vst.msk [vmem:[#allocation3] sm:$0x3] %vm631_vm8, %v629_v62  ;;  %4414 = vmatmul.mubr.msk.f32.vlgmr.msra.gmra.mrb[2].mxu1 %vm144_vm9, %v629_v62 }
 0x6c6   :  { %4748 = vmatpush3.bf16.msra.mxu1 %v5052_v12  ;;  %4424 = vmatprep.mubr.msk.f32.mxu1 %vm4982_vm0, %v4983_v8 }
 0x6c7   :  { %4749 = vmatprep.subr.bf16.mxu1 %v4981_v2 }
 0x6c8   :  { %v708_v0 = vpop.permute.xlu1 %707 }
 0x6ca   :  { %4751 = vmatpush3.bf16.msra.mxu1 %v5063_v15 }
 0x6cb   :  { %4758 = vmatprep.subr.bf16.mxu1 %v4981_v2 }
 0x6cd   :  { %4425 = vmatmul.mubr.msk.f32.vlgmr.msra.gmra.mrb[2].mxu1 %vm144_vm9, %v708_v0 }
 0x6ce   :  { %4760 = vmatpush3.bf16.msra.mxu1 %v5028_v5  ;;  %4456 = vmatprep.mubr.msk.f32.mxu1 %vm4982_vm0, %v4983_v8 }
 0x6cf   :  { %4761 = vmatprep.subr.bf16.mxu1 %v4981_v2 }
 0x6d2   :  { %4763 = vmatpush3.bf16.msra.mxu1 %v5042_v9 }
 0x6d3   :  { %4764 = vmatprep.subr.bf16.mxu1 %v4981_v2 }
 0x7a0   :  { %v777_v1 = vpop.f32.mrb[2].mxu1 }
 0x7a1   :  { %v4875_v3 = vadd.f32 %v777_v1, %v5109_v42  ;;  %v4426_v4 = vpop.f32.mrb[3].mxu1 }
 0x7a3   :  { %v782_v6 = vmax.f32 %v4875_v3, 0.0 }
 0x7a5   :  { %4430 = vmatmul.mubr.msk.f32.vlgmr.msra.gmra.mrb[8].mxu0 %vm71_vm3, %v782_v6 }
 0x7a6   :  { %4754 = vmatpush3.bf16.msra.mxu0 %v5145_v20  ;;  %4440 = vmatprep.mubr.msk.f32.mxu0 %vm4982_vm0, %v4983_v8 }
 0x7a7   :  { %4755 = vmatprep.subr.bf16.mxu0 %v4981_v2 }
 0x7aa   :  { %4757 = vmatpush3.bf16.msra.mxu0 %v5151_v22 }
 0x7ab   :  { %4443 = vmatprep.subr.mxu0 %v4983_v8 }
 0x7ad   :  { %4441 = vmatmul.mubr.msk.f32.vlgmr.msra.gmra.mrb[10].mxu0 %vm144_vm9, %v629_v62 }
 0x7ae   :  { %4444 = vmatpush3.msk.msra.mxu0 %vm525_vm5, %v5166_v31  ;;  %4445 = vmatprep.mubr.msk.f32.mxu0 %vm4982_vm0, %v4983_v8 }
 0x7af   :  { %4470 = vmatprep.subr.mxu0 %v4983_v8 }
 0x878   :  { %v852_v7 = vpop.f32.mrb[8].mxu0 }
 0x879   :  { %v853_v10 = vadd.f32 %v5118_v46, %v852_v7  ;;  %v4431_v11 = vpop.f32.mrb[9].mxu0 }
 0x87b   :  { %v856_v13 = vsel %vm368_vm4, %v853_v10, -inf }
 0x87c   :  { %857 = vmax.xlane.f32.xlu1 %v856_v13 }
 0x880   :  { %v986_v14 = vpop.f32.mrb[10].mxu0 }
 0x881   :  { %v4442_v16 = vpop.f32.mrb[11].mxu0 }
 0x909   :  { %v858_v19 = vpop.xlane.xlu1 %857 }
 0x90a   :  { %v859_v21 = vsub.f32 %v853_v10, %v858_v19 }
 0x90c   :  { %v860_v23 = vmul.f32 1.442695, %v859_v21 }
 0x90e   :  { %4918 = vpow2.f32 %v860_v23 }
 0x918   :  { %v4919_v24 = vpop.eup %4918 }
 0x919   :  { %v862_v26 = vsel %vm368_vm4, %v4919_v24, 0.0  ;;  %v872_v27 = vrot.slane %v4919_v24, %v5122_v59 }
 0x91a   :  { %863 = vadd.xlane.f32.xlu0 %v862_v26 }
 0x91b   :  { %v880_v28 = vrot.slane %v872_v27, %v5122_v59  ;;  %v873_v29 = vcombine.high %v872_v27, %v872_v27 }
 0x91d   :  { %v891_v30 = vrot.slane %v880_v28, %v5126_v63  ;;  %v887_v32 = vrot.slane %v873_v29, %v5122_v59 }
 0x91f   :  { %v898_v33 = vmul.f32 %v891_v30, %v5084_v17  ;;  %v895_v34 = vrot.slane %v887_v32, %v5126_v63 }
 0x921   :  { %v900_v35 = vsel %vm48_vm1, %v898_v33, 0.0  ;;  %v899_v36 = vmul.f32 %v895_v34, %v5089_v18 }
 0x922   :  { %901 = vadd.xlane.f32.xlu1 %v900_v35 }
 0x923   :  { %v903_v39 = vsel %vm48_vm1, %v899_v36, 0.0 }
 0x924   :  { %904 = vadd.xlane.f32.xlu0 %v903_v39 }
 0x9a7   :  { %v864_v40 = vpop.xlane.xlu0 %863 }
 0x9a8   :  { %4920 = vrcp.f32 %v864_v40 }
 0x9af   :  { %v902_v47 = vpop.xlane.xlu1 %901 }
 0x9b1   :  { %v905_v48 = vpop.xlane.xlu0 %904 }
 0x9b2   :  { %v4921_v41 = vpop.eup %4920 }
 0x9b3   :  { %v911_v43 = vrot.slane %v4921_v41, %v5126_v63  ;;  %v915_v45 = vrot.slane %v4921_v41, %v5159_v25 }
 0x9b5   :  { %v918_v49 = vmul.f32 %v911_v43, %v902_v47  ;;  %v919_v50 = vmul.f32 %v915_v45, %v905_v48 }
 0x9b7   :  { %993 = vperm.xlu1 %4909, %v918_v49   ;;  %996 = vperm.xlu0 %4908, %v919_v50  }
 0xa36   :  { %v994_v51 = vpop.permute.xlu1 %993  ;;  %v997_v52 = vpop.permute.xlu0 %996 }
 0xa37   :  { %v1001_v53 = vrot.slane %v994_v51, %v5171_v37  ;;  %v1005_v54 = vrot.slane %v997_v52, %v5171_v37 }
 0xa39   :  { %v1006_v55 = vsel %vm69_vm2, %v1005_v54, %v1001_v53 }
 0xa3a   :  { %1101 = vst.msk [vmem:[#allocation2 + $0x2] sm:$0x3] %vm625_vm6, %v1006_v55  ;;  %4446 = vmatmul.mubr.msk.f32.vlgmr.msra.gmra.mrb[12].mxu0 %vm522_vm7, %v1006_v55 }
 0xa3b   :  { %4471 = vmatpush3.msra.mxu0 %v5102_v38  ;;  %4472 = vmatprep.mubr.msk.f32.mxu0 %vm4982_vm0, %v4983_v8 }
 0xa3c   :  { %4770 = vmatprep.subr.bf16.mxu0 %v4981_v2 }
 0xb0d   :  { %v1075_v56 = vpop.f32.mrb[12].mxu0 }
 0xb0e   :  { %v1076_v58 = vadd.f32 %v1075_v56, %v986_v14  ;;  %v4447_v60 = vpop.f32.mrb[13].mxu0 }
 0xb10   :  { %v1079_v61 = vadd.f32 %v5185_v44, %v1076_v58 }
 0xb12   :  { %4922 = vtanh.f32 %v1079_v61 }
 0xb1c   :  { %v4923_v62 = vpop.eup %4922 }
 0xb1d   :  { %1085 = vrot.lane.b32.xlu1 %v4923_v62, %s4985_s8  ;;  %v1081_v0 = vadd.f32 1.0, %v4923_v62 }
 0xb1f   :  { %v1082_v1 = vmul.f32 0.5, %v1081_v0 }
 0xb21   :  { %v1083_v6 = vmul.f32 %v1082_v1, %v5190_v57 }
 0xb8f   :  { %v1086_v3 = vpop.permute.xlu1 %1085 }
 0xb90   :  { %v1088_v4 = vmul.f32 %v1086_v3, %v1082_v1 }
 0xb92   :  { %1090 = vrot.lane.b32.xlu1 %v1088_v4, %s4986_s9 }
 0xc04   :  { %v1091_v7 = vpop.permute.xlu1 %1090 }
 0xc05   :  { %v5253_v10 = vadd.f32 %v1091_v7, %v1083_v6 }
 0xc07   :  { %4924 = vtanh.f32 %v5253_v10 }
 0xc11   :  { %v4925_v11 = vpop.eup %4924 }
 0xc12   :  { %1096 = vrot.lane.b32.xlu0 %v4925_v11, %s4985_s8 }
 0xc16   :  { %1181 = vrot.lane.b32.xlu0 %v5253_v10, %s4987_s10 }
 0xc84   :  { %v1097_v13 = vpop.permute.xlu0 %1096 }
 0xc85   :  { %v1099_v14 = vmul.f32 %v1097_v13, %v1082_v1 }
 0xc87   :  { %1103 = vrot.lane.b32.xlu1 %v1099_v14, %s4986_s9 }
 0xc88   :  { %v1182_v57 = vpop.permute.xlu0 %1181 }
 0xcf9   :  { %v1104_v16 = vpop.permute.xlu1 %1103 }
 0xcfa   :  { %1106 = vst.msk [vmem:[#allocation3 + $0x2] sm:$0x3] %vm631_vm8, %v1104_v16  ;;  %4457 = vmatmul.mubr.msk.f32.vlgmr.msra.gmra.mrb[4].mxu1 %vm144_vm9, %v1104_v16 }
 0xcfb   :  { %4766 = vmatpush3.bf16.msra.mxu1 %v5052_v12  ;;  %4467 = vmatprep.mubr.msk.f32.mxu1 %vm4982_vm0, %v4983_v8 }
 0xcfc   :  { %4767 = vmatprep.subr.bf16.mxu1 %v4981_v2 }
 0xcff   :  { %4769 = vmatpush3.bf16.msra.mxu1 %v5063_v15 }
 0xd00   :  { %4776 = vmatprep.subr.bf16.mxu1 %v4981_v2 }
 0xd02   :  { %4468 = vmatmul.mubr.msk.f32.vlgmr.msra.gmra.mrb[4].mxu1 %vm144_vm9, %v1182_v57 }
 0xd03   :  { %4778 = vmatpush3.bf16.msra.mxu1 %v5028_v5  ;;  %4499 = vmatprep.mubr.msk.f32.mxu1 %vm4982_vm0, %v4983_v8 }
 0xd04   :  { %4779 = vmatprep.subr.bf16.mxu1 %v4981_v2 }
 0xd07   :  { %4781 = vmatpush3.bf16.msra.mxu1 %v5042_v9 }
 0xd08   :  { %4782 = vmatprep.subr.bf16.mxu1 %v4981_v2 }
 0xdd5   :  { %v1251_v19 = vpop.f32.mrb[4].mxu1 }
 0xdd6   :  { %v4876_v21 = vadd.f32 %v1251_v19, %v5109_v42  ;;  %v4469_v23 = vpop.f32.mrb[5].mxu1 }
 0xdd8   :  { %v1256_v24 = vmax.f32 %v4876_v21, 0.0 }
 0xdda   :  { %4473 = vmatmul.mubr.msk.f32.vlgmr.msra.gmra.mrb[14].mxu0 %vm71_vm3, %v1256_v24 }
 0xddb   :  { %4772 = vmatpush3.bf16.msra.mxu0 %v5145_v20  ;;  %4483 = vmatprep.mubr.msk.f32.mxu0 %vm4982_vm0, %v4983_v8 }
 0xddc   :  { %4773 = vmatprep.subr.bf16.mxu0 %v4981_v2 }
 0xddf   :  { %4775 = vmatpush3.bf16.msra.mxu0 %v5151_v22 }
 0xde0   :  { %4486 = vmatprep.subr.mxu0 %v4983_v8 }
 0xde2   :  { %4484 = vmatmul.mubr.msk.f32.vlgmr.msra.gmra.mrb[16].mxu0 %vm144_vm9, %v1104_v16 }
 0xde3   :  { %4487 = vmatpush3.msk.msra.mxu0 %vm525_vm5, %v5166_v31  ;;  %4488 = vmatprep.mubr.msk.f32.mxu0 %vm4982_vm0, %v4983_v8 }
 0xde4   :  { %4513 = vmatprep.subr.mxu0 %v4983_v8 }
 0xead   :  { %v1326_v26 = vpop.f32.mrb[14].mxu0 }
 0xeae   :  { %v1327_v27 = vadd.f32 %v5118_v46, %v1326_v26  ;;  %v4474_v28 = vpop.f32.mrb[15].mxu0 }
 0xeb0   :  { %v1330_v29 = vsel %vm368_vm4, %v1327_v27, -inf }
 0xeb1   :  { %1331 = vmax.xlane.f32.xlu1 %v1330_v29 }
 0xeb5   :  { %v1460_v30 = vpop.f32.mrb[16].mxu0 }
 0xeb6   :  { %v4485_v32 = vpop.f32.mrb[17].mxu0 }
 0xf3e   :  { %v1332_v33 = vpop.xlane.xlu1 %1331 }
 0xf3f   :  { %v1333_v34 = vsub.f32 %v1327_v27, %v1332_v33 }
 0xf41   :  { %v1334_v35 = vmul.f32 1.442695, %v1333_v34 }
 0xf43   :  { %4926 = vpow2.f32 %v1334_v35 }
 0xf4d   :  { %v4927_v36 = vpop.eup %4926 }
 0xf4e   :  { %v1336_v39 = vsel %vm368_vm4, %v4927_v36, 0.0  ;;  %v1346_v40 = vrot.slane %v4927_v36, %v5122_v59 }
 0xf4f   :  { %1337 = vadd.xlane.f32.xlu0 %v1336_v39 }
 0xf50   :  { %v1354_v41 = vrot.slane %v1346_v40, %v5122_v59  ;;  %v1347_v43 = vcombine.high %v1346_v40, %v1346_v40 }
 0xf52   :  { %v1365_v45 = vrot.slane %v1354_v41, %v5126_v63  ;;  %v1361_v47 = vrot.slane %v1347_v43, %v5122_v59 }
 0xf54   :  { %v1372_v48 = vmul.f32 %v1365_v45, %v5084_v17  ;;  %v1369_v49 = vrot.slane %v1361_v47, %v5126_v63 }
 0xf56   :  { %v1374_v50 = vsel %vm48_vm1, %v1372_v48, 0.0  ;;  %v1373_v51 = vmul.f32 %v1369_v49, %v5089_v18 }
 0xf57   :  { %1375 = vadd.xlane.f32.xlu0 %v1374_v50 }
 0xf58   :  { %v1377_v52 = vsel %vm48_vm1, %v1373_v51, 0.0 }
 0xf59   :  { %1378 = vadd.xlane.f32.xlu1 %v1377_v52 }
 0xfdc   :  { %v1338_v53 = vpop.xlane.xlu0 %1337 }
 0xfdd   :  { %4928 = vrcp.f32 %v1338_v53 }
 0xfe4   :  { %v1376_v58 = vpop.xlane.xlu0 %1375 }
 0xfe6   :  { %v1379_v60 = vpop.xlane.xlu1 %1378 }
 0xfe7   :  { %v4929_v54 = vpop.eup %4928 }
 0xfe8   :  { %v1385_v55 = vrot.slane %v4929_v54, %v5126_v63  ;;  %v1389_v56 = vrot.slane %v4929_v54, %v5159_v25 }
 0xfea   :  { %v1392_v61 = vmul.f32 %v1385_v55, %v1376_v58  ;;  %v1393_v62 = vmul.f32 %v1389_v56, %v1379_v60 }
 0xfec   :  { %1470 = vperm.xlu1 %4909, %v1393_v62   ;;  %1467 = vperm.xlu0 %4908, %v1392_v61  }
0x106b   :  { %v1471_v0 = vpop.permute.xlu1 %1470  ;;  %v1468_v1 = vpop.permute.xlu0 %1467 }
0x106c   :  { %v1479_v3 = vrot.slane %v1471_v0, %v5171_v37  ;;  %v1475_v4 = vrot.slane %v1468_v1, %v5171_v37 }
0x106e   :  { %v1480_v6 = vsel %vm69_vm2, %v1479_v3, %v1475_v4 }
0x106f   :  { %1575 = vst.msk [vmem:[#allocation2 + $0x4] sm:$0x3] %vm625_vm6, %v1480_v6  ;;  %4489 = vmatmul.mubr.msk.f32.vlgmr.msra.gmra.mrb[18].mxu0 %vm522_vm7, %v1480_v6 }
0x1070   :  { %4514 = vmatpush3.msra.mxu0 %v5102_v38  ;;  %4515 = vmatprep.mubr.msk.f32.mxu0 %vm4982_vm0, %v4983_v8 }
0x1071   :  { %4788 = vmatprep.subr.bf16.mxu0 %v4981_v2 }
0x1142   :  { %v1549_v7 = vpop.f32.mrb[18].mxu0 }
0x1143   :  { %v1550_v11 = vadd.f32 %v1549_v7, %v1460_v30  ;;  %v4490_v13 = vpop.f32.mrb[19].mxu0 }
0x1145   :  { %v1553_v14 = vadd.f32 %v5185_v44, %v1550_v11 }
0x1147   :  { %4930 = vtanh.f32 %v1553_v14 }
0x1151   :  { %v4931_v16 = vpop.eup %4930 }
0x1152   :  { %1559 = vrot.lane.b32.xlu1 %v4931_v16, %s4985_s8  ;;  %v1555_v57 = vadd.f32 1.0, %v4931_v16 }
0x1154   :  { %v1556_v19 = vmul.f32 0.5, %v1555_v57 }
0x1156   :  { %v1557_v24 = vmul.f32 %v1556_v19, %v5253_v10 }
0x11c4   :  { %v1560_v21 = vpop.permute.xlu1 %1559 }
0x11c5   :  { %v1562_v23 = vmul.f32 %v1560_v21, %v1556_v19 }
0x11c7   :  { %1564 = vrot.lane.b32.xlu0 %v1562_v23, %s4986_s9 }
0x1239   :  { %v1565_v26 = vpop.permute.xlu0 %1564 }
0x123a   :  { %v5316_v27 = vadd.f32 %v1565_v26, %v1557_v24 }
0x123c   :  { %4932 = vtanh.f32 %v5316_v27 }
0x1246   :  { %v4933_v28 = vpop.eup %4932 }
0x1247   :  { %1570 = vrot.lane.b32.xlu1 %v4933_v28, %s4985_s8 }
0x124b   :  { %1655 = vrot.lane.b32.xlu1 %v5316_v27, %s4987_s10 }
0x12b9   :  { %v1571_v29 = vpop.permute.xlu1 %1570 }
0x12ba   :  { %v1573_v30 = vmul.f32 %v1571_v29, %v1556_v19 }
0x12bc   :  { %1577 = vrot.lane.b32.xlu0 %v1573_v30, %s4986_s9 }
0x12bd   :  { %v1656_v10 = vpop.permute.xlu1 %1655 }
0x132e   :  { %v1578_v32 = vpop.permute.xlu0 %1577 }
0x132f   :  { %1580 = vst.msk [vmem:[#allocation3 + $0x4] sm:$0x3] %vm631_vm8, %v1578_v32  ;;  %4500 = vmatmul.mubr.msk.f32.vlgmr.msra.gmra.mrb[6].mxu1 %vm144_vm9, %v1578_v32 }
0x1330   :  { %4784 = vmatpush3.bf16.msra.mxu1 %v5052_v12  ;;  %4510 = vmatprep.mubr.msk.f32.mxu1 %vm4982_vm0, %v4983_v8 }
0x1331   :  { %4785 = vmatprep.subr.bf16.mxu1 %v4981_v2 }
0x1334   :  { %4787 = vmatpush3.bf16.msra.mxu1 %v5063_v15 }
0x1335   :  { %4794 = vmatprep.subr.bf16.mxu1 %v4981_v2 }
0x1337   :  { %4511 = vmatmul.mubr.msk.f32.vlgmr.msra.gmra.mrb[6].mxu1 %vm144_vm9, %v1656_v10 }
0x1338   :  { %4796 = vmatpush3.bf16.msra.mxu1 %v5028_v5  ;;  %4542 = vmatprep.mubr.msk.f32.mxu1 %vm4982_vm0, %v4983_v8 }
0x1339   :  { %4797 = vmatprep.subr.bf16.mxu1 %v4981_v2 }
0x133c   :  { %4799 = vmatpush3.bf16.msra.mxu1 %v5042_v9 }
0x133d   :  { %4800 = vmatprep.subr.bf16.mxu1 %v4981_v2 }
0x140a   :  { %v1725_v33 = vpop.f32.mrb[6].mxu1 }
0x140b   :  { %v4877_v34 = vadd.f32 %v1725_v33, %v5109_v42  ;;  %v4512_v35 = vpop.f32.mrb[7].mxu1 }
0x140d   :  { %v1730_v36 = vmax.f32 %v4877_v34, 0.0 }
0x140f   :  { %4516 = vmatmul.mubr.msk.f32.vlgmr.msra.gmra.mrb[20].mxu0 %vm71_vm3, %v1730_v36 }
0x1410   :  { %4790 = vmatpush3.bf16.msra.mxu0 %v5145_v20  ;;  %4526 = vmatprep.mubr.msk.f32.mxu0 %vm4982_vm0, %v4983_v8 }
0x1411   :  { %4791 = vmatprep.subr.bf16.mxu0 %v4981_v2 }
0x1414   :  { %4793 = vmatpush3.bf16.msra.mxu0 %v5151_v22 }
0x1415   :  { %4529 = vmatprep.subr.mxu0 %v4983_v8 }
0x1417   :  { %4527 = vmatmul.mubr.msk.f32.vlgmr.msra.gmra.mrb[22].mxu0 %vm144_vm9, %v1578_v32 }
0x1418   :  { %4530 = vmatpush3.msk.msra.mxu0 %vm525_vm5, %v5166_v31  ;;  %4531 = vmatprep.mubr.msk.f32.mxu0 %vm4982_vm0, %v4983_v8 }
0x1419   :  { %4556 = vmatprep.subr.mxu0 %v4983_v8 }
0x14e2   :  { %v1800_v39 = vpop.f32.mrb[20].mxu0 }
0x14e3   :  { %v1801_v40 = vadd.f32 %v5118_v46, %v1800_v39  ;;  %v4517_v41 = vpop.f32.mrb[21].mxu0 }
0x14e5   :  { %v1804_v43 = vsel %vm368_vm4, %v1801_v40, -inf }
0x14e6   :  { %1805 = vmax.xlane.f32.xlu0 %v1804_v43 }
0x14ea   :  { %v1934_v45 = vpop.f32.mrb[22].mxu0 }
0x14eb   :  { %v4528_v47 = vpop.f32.mrb[23].mxu0 }
0x1573   :  { %v1806_v48 = vpop.xlane.xlu0 %1805 }
0x1574   :  { %v1807_v49 = vsub.f32 %v1801_v40, %v1806_v48 }
0x1576   :  { %v1808_v50 = vmul.f32 1.442695, %v1807_v49 }
0x1578   :  { %4934 = vpow2.f32 %v1808_v50 }
0x1582   :  { %v4935_v51 = vpop.eup %4934 }
0x1583   :  { %v1810_v52 = vsel %vm368_vm4, %v4935_v51, 0.0  ;;  %v1820_v53 = vrot.slane %v4935_v51, %v5122_v59 }
0x1584   :  { %1811 = vadd.xlane.f32.xlu1 %v1810_v52 }
0x1585   :  { %v1828_v54 = vrot.slane %v1820_v53, %v5122_v59  ;;  %v1821_v55 = vcombine.high %v1820_v53, %v1820_v53 }
0x1587   :  { %v1839_v56 = vrot.slane %v1828_v54, %v5126_v63  ;;  %v1835_v58 = vrot.slane %v1821_v55, %v5122_v59 }
0x1589   :  { %v1846_v60 = vmul.f32 %v1839_v56, %v5084_v17  ;;  %v1843_v61 = vrot.slane %v1835_v58, %v5126_v63 }
0x158b   :  { %v1848_v62 = vsel %vm48_vm1, %v1846_v60, 0.0  ;;  %v1847_v0 = vmul.f32 %v1843_v61, %v5089_v18 }
0x158c   :  { %1849 = vadd.xlane.f32.xlu0 %v1848_v62 }
0x158d   :  { %v1851_v1 = vsel %vm48_vm1, %v1847_v0, 0.0 }
0x1590   :  { %1852 = vadd.xlane.f32.xlu0 %v1851_v1 }
0x1611   :  { %v1812_v3 = vpop.xlane.xlu1 %1811 }
0x1612   :  { %4936 = vrcp.f32 %v1812_v3 }
0x1619   :  { %v1850_v4 = vpop.xlane.xlu0 %1849 }
0x161c   :  { %v4937_v6 = vpop.eup %4936 }
0x161d   :  { %v1859_v7 = vrot.slane %v4937_v6, %v5126_v63  ;;  %v1853_v11 = vpop.xlane.xlu0 %1852  ;;  %v1863_v13 = vrot.slane %v4937_v6, %v5159_v25 }
0x161f   :  { %v1866_v14 = vmul.f32 %v1859_v7, %v1850_v4  ;;  %v1867_v16 = vmul.f32 %v1863_v13, %v1853_v11 }
0x1621   :  { %1944 = vperm.xlu0 %4908, %v1867_v16   ;;  %1941 = vperm.xlu1 %4909, %v1866_v14  }
0x16a0   :  { %v1945_v57 = vpop.permute.xlu0 %1944  ;;  %v1942_v19 = vpop.permute.xlu1 %1941 }
0x16a1   :  { %v1953_v21 = vrot.slane %v1945_v57, %v5171_v37  ;;  %v1949_v23 = vrot.slane %v1942_v19, %v5171_v37 }
0x16a3   :  { %v1954_v24 = vsel %vm69_vm2, %v1953_v21, %v1949_v23 }
0x16a4   :  { %2049 = vst.msk [vmem:[#allocation2 + $0x6] sm:$0x3] %vm625_vm6, %v1954_v24  ;;  %4532 = vmatmul.mubr.msk.f32.vlgmr.msra.gmra.mrb[24].mxu0 %vm522_vm7, %v1954_v24 }
0x16a5   :  { %4557 = vmatpush3.msra.mxu0 %v5102_v38  ;;  %4558 = vmatprep.mubr.msk.f32.mxu0 %vm4982_vm0, %v4983_v8 }
0x16a6   :  { %4806 = vmatprep.subr.bf16.mxu0 %v4981_v2 }
0x1777   :  { %v2023_v26 = vpop.f32.mrb[24].mxu0 }
0x1778   :  { %v2024_v28 = vadd.f32 %v2023_v26, %v1934_v45  ;;  %v4533_v29 = vpop.f32.mrb[25].mxu0 }
0x177a   :  { %v2027_v30 = vadd.f32 %v5185_v44, %v2024_v28 }
0x177c   :  { %4938 = vtanh.f32 %v2027_v30 }
0x1786   :  { %v4939_v32 = vpop.eup %4938 }
0x1787   :  { %2033 = vrot.lane.b32.xlu1 %v4939_v32, %s4985_s8  ;;  %v2029_v10 = vadd.f32 1.0, %v4939_v32 }
0x1789   :  { %v2030_v33 = vmul.f32 0.5, %v2029_v10 }
0x178b   :  { %v2031_v36 = vmul.f32 %v2030_v33, %v5316_v27 }
0x17f9   :  { %v2034_v34 = vpop.permute.xlu1 %2033 }
0x17fa   :  { %v2036_v35 = vmul.f32 %v2034_v34, %v2030_v33 }
0x17fc   :  { %2038 = vrot.lane.b32.xlu1 %v2036_v35, %s4986_s9 }
0x186e   :  { %v2039_v39 = vpop.permute.xlu1 %2038 }
0x186f   :  { %v5379_v40 = vadd.f32 %v2039_v39, %v2031_v36 }
0x1871   :  { %4940 = vtanh.f32 %v5379_v40 }
0x187b   :  { %v4941_v41 = vpop.eup %4940 }
0x187c   :  { %2044 = vrot.lane.b32.xlu0 %v4941_v41, %s4985_s8 }
0x1880   :  { %2129 = vrot.lane.b32.xlu0 %v5379_v40, %s4987_s10 }
0x18ee   :  { %v2045_v43 = vpop.permute.xlu0 %2044 }
0x18ef   :  { %v2047_v45 = vmul.f32 %v2045_v43, %v2030_v33 }
0x18f1   :  { %2051 = vrot.lane.b32.xlu1 %v2047_v45, %s4986_s9 }
0x18f2   :  { %v2130_v27 = vpop.permute.xlu0 %2129 }
0x1963   :  { %v2052_v47 = vpop.permute.xlu1 %2051 }
0x1964   :  { %2054 = vst.msk [vmem:[#allocation3 + $0x6] sm:$0x3] %vm631_vm8, %v2052_v47  ;;  %4543 = vmatmul.mubr.msk.f32.vlgmr.msra.gmra.mrb[8].mxu1 %vm144_vm9, %v2052_v47 }
0x1965   :  { %4802 = vmatpush3.bf16.msra.mxu1 %v5052_v12  ;;  %4553 = vmatprep.mubr.msk.f32.mxu1 %vm4982_vm0, %v4983_v8 }
0x1966   :  { %4803 = vmatprep.subr.bf16.mxu1 %v4981_v2 }
0x1969   :  { %4805 = vmatpush3.bf16.msra.mxu1 %v5063_v15 }
0x196a   :  { %4812 = vmatprep.subr.bf16.mxu1 %v4981_v2 }
0x196c   :  { %4554 = vmatmul.mubr.msk.f32.vlgmr.msra.gmra.mrb[8].mxu1 %vm144_vm9, %v2130_v27 }
0x196d   :  { %4814 = vmatpush3.bf16.msra.mxu1 %v5028_v5  ;;  %4585 = vmatprep.mubr.msk.f32.mxu1 %vm4982_vm0, %v4983_v8 }
0x196e   :  { %4815 = vmatprep.subr.bf16.mxu1 %v4981_v2 }
0x1971   :  { %4817 = vmatpush3.bf16.msra.mxu1 %v5042_v9 }
0x1972   :  { %4818 = vmatprep.subr.bf16.mxu1 %v4981_v2 }
0x1a3f   :  { %v2199_v48 = vpop.f32.mrb[8].mxu1 }
0x1a40   :  { %v4878_v49 = vadd.f32 %v2199_v48, %v5109_v42  ;;  %v4555_v50 = vpop.f32.mrb[9].mxu1 }
0x1a42   :  { %v2204_v51 = vmax.f32 %v4878_v49, 0.0 }
0x1a44   :  { %4559 = vmatmul.mubr.msk.f32.vlgmr.msra.gmra.mrb[26].mxu0 %vm71_vm3, %v2204_v51 }
0x1a45   :  { %4808 = vmatpush3.bf16.msra.mxu0 %v5145_v20  ;;  %4569 = vmatprep.mubr.msk.f32.mxu0 %vm4982_vm0, %v4983_v8 }
0x1a46   :  { %4809 = vmatprep.subr.bf16.mxu0 %v4981_v2 }
0x1a49   :  { %4811 = vmatpush3.bf16.msra.mxu0 %v5151_v22 }
0x1a4a   :  { %4572 = vmatprep.subr.mxu0 %v4983_v8 }
0x1a4c   :  { %4570 = vmatmul.mubr.msk.f32.vlgmr.msra.gmra.mrb[28].mxu0 %vm144_vm9, %v2052_v47 }
0x1a4d   :  { %4573 = vmatpush3.msk.msra.mxu0 %vm525_vm5, %v5166_v31  ;;  %4574 = vmatprep.mubr.msk.f32.mxu0 %vm4982_vm0, %v4983_v8 }
0x1a4e   :  { %4599 = vmatprep.subr.mxu0 %v4983_v8 }
0x1b17   :  { %v2274_v52 = vpop.f32.mrb[26].mxu0 }
0x1b18   :  { %v2275_v53 = vadd.f32 %v5118_v46, %v2274_v52  ;;  %v4560_v54 = vpop.f32.mrb[27].mxu0 }
0x1b1a   :  { %v2278_v55 = vsel %vm368_vm4, %v2275_v53, -inf }
0x1b1b   :  { %2279 = vmax.xlane.f32.xlu1 %v2278_v55 }
0x1b1f   :  { %v2408_v56 = vpop.f32.mrb[28].mxu0 }
0x1b20   :  { %v4571_v58 = vpop.f32.mrb[29].mxu0 }
0x1ba8   :  { %v2280_v60 = vpop.xlane.xlu1 %2279 }
0x1ba9   :  { %v2281_v61 = vsub.f32 %v2275_v53, %v2280_v60 }
0x1bab   :  { %v2282_v62 = vmul.f32 1.442695, %v2281_v61  ;;  %v5481_v61 = vld [vmem:[%s5683_s2 + $0x51] ss:$0 sm:$0xff] }
0x1bad   :  { %4942 = vpow2.f32 %v2282_v62 }
0x1bb7   :  { %v4943_v0 = vpop.eup %4942 }
0x1bb8   :  { %v2284_v1 = vsel %vm368_vm4, %v4943_v0, 0.0  ;;  %v2294_v3 = vrot.slane %v4943_v0, %v5122_v59 }
0x1bb9   :  { %2285 = vadd.xlane.f32.xlu0 %v2284_v1 }
0x1bba   :  { %v2302_v4 = vrot.slane %v2294_v3, %v5122_v59  ;;  %v2295_v6 = vcombine.high %v2294_v3, %v2294_v3 }
0x1bbc   :  { %v2313_v46 = vrot.slane %v2302_v4, %v5126_v63  ;;  %v2309_v7 = vrot.slane %v2295_v6, %v5122_v59 }
0x1bbe   :  { %v2320_v11 = vmul.f32 %v2313_v46, %v5084_v17  ;;  %v2317_v13 = vrot.slane %v2309_v7, %v5126_v63 }
0x1bc0   :  { %v2322_v14 = vsel %vm48_vm1, %v2320_v11, 0.0  ;;  %v2321_v16 = vmul.f32 %v2317_v13, %v5089_v18 }
0x1bc1   :  { %2323 = vadd.xlane.f32.xlu0 %v2322_v14 }
0x1bc2   :  { %v2325_v57 = vsel %vm48_vm1, %v2321_v16, 0.0 }
0x1bc3   :  { %2326 = vadd.xlane.f32.xlu1 %v2325_v57 }
0x1c46   :  { %v2286_v19 = vpop.xlane.xlu0 %2285 }
0x1c47   :  { %4944 = vrcp.f32 %v2286_v19 }
0x1c4e   :  { %v2324_v26 = vpop.xlane.xlu0 %2323 }
0x1c50   :  { %v2327_v28 = vpop.xlane.xlu1 %2326 }
0x1c51   :  { %v4945_v21 = vpop.eup %4944 }
0x1c52   :  { %v2333_v23 = vrot.slane %v4945_v21, %v5126_v63  ;;  %v2337_v24 = vrot.slane %v4945_v21, %v5159_v25  ;;  %v5493_v21 = vld [vmem:[%s5684_s0] sm:$0xf] }
0x1c54   :  { %v2340_v17 = vmul.f32 %v2333_v23, %v2324_v26  ;;  %v2341_v29 = vmul.f32 %v2337_v24, %v2327_v28  ;;  %v5501_v28 = vld [vmem:[%s5684_s0 + $0x4] sm:$0xf] }
0x1c56   :  { %2418 = vperm.xlu1 %4909, %v2341_v29   ;;  %2415 = vperm.xlu0 %4908, %v2340_v17  }
0x1cd5   :  { %v2419_v30 = vpop.permute.xlu1 %2418  ;;  %v2416_v32 = vpop.permute.xlu0 %2415 }
0x1cd6   :  { %v2427_v18 = vrot.slane %v2419_v30, %v5171_v37  ;;  %v2423_v10 = vrot.slane %v2416_v32, %v5171_v37 }
0x1cd8   :  { %v2428_v33 = vsel %vm69_vm2, %v2427_v18, %v2423_v10 }
0x1cd9   :  { %2523 = vst.msk [vmem:[#allocation2 + $0x8] sm:$0x3] %vm625_vm6, %v2428_v33  ;;  %4575 = vmatmul.mubr.msk.f32.vlgmr.msra.gmra.mrb[30].mxu0 %vm522_vm7, %v2428_v33 }
0x1cda   :  { %4600 = vmatpush3.msra.mxu0 %v5102_v38  ;;  %4601 = vmatprep.mubr.msk.f32.mxu0 %vm4982_vm0, %v4983_v8 }
0x1cdb   :  { %4824 = vmatprep.subr.bf16.mxu0 %v4981_v2 }
0x1dac   :  { %v2497_v34 = vpop.f32.mrb[30].mxu0 }
0x1dad   :  { %v2498_v35 = vadd.f32 %v2497_v34, %v2408_v56  ;;  %v4576_v36 = vpop.f32.mrb[31].mxu0 }
0x1daf   :  { %v2501_v39 = vadd.f32 %v5185_v44, %v2498_v35 }
0x1db1   :  { %4946 = vtanh.f32 %v2501_v39 }
0x1dbb   :  { %v4947_v41 = vpop.eup %4946 }
0x1dbc   :  { %2507 = vrot.lane.b32.xlu1 %v4947_v41, %s4985_s8  ;;  %v2503_v43 = vadd.f32 1.0, %v4947_v41 }
0x1dbe   :  { %v2504_v45 = vmul.f32 0.5, %v2503_v43 }
0x1dc0   :  { %v2505_v38 = vmul.f32 %v2504_v45, %v5379_v40 }
0x1e2e   :  { %v2508_v47 = vpop.permute.xlu1 %2507 }
0x1e2f   :  { %v2510_v27 = vmul.f32 %v2508_v47, %v2504_v45 }
0x1e31   :  { %2512 = vrot.lane.b32.xlu0 %v2510_v27, %s4986_s9  ;;  %v5515_v27 = vld [vmem:[%s5683_s2 + $0x48] sm:$0xff] }
0x1ea3   :  { %v2513_v48 = vpop.permute.xlu0 %2512 }
0x1ea4   :  { %v5442_v49 = vadd.f32 %v2513_v48, %v2505_v38 }
0x1ea6   :  { %4948 = vtanh.f32 %v5442_v49 }
0x1eb0   :  { %v4949_v50 = vpop.eup %4948 }
0x1eb1   :  { %2518 = vrot.lane.b32.xlu1 %v4949_v50, %s4985_s8 }
0x1eb5   :  { %2603 = vrot.lane.b32.xlu1 %v5442_v49, %s4987_s10 }
0x1f23   :  { %v2519_v51 = vpop.permute.xlu1 %2518 }
0x1f24   :  { %v2521_v52 = vmul.f32 %v2519_v51, %v2504_v45 }
0x1f26   :  { %2525 = vrot.lane.b32.xlu0 %v2521_v52, %s4986_s9 }
0x1f27   :  { %v2604_v40 = vpop.permute.xlu1 %2603 }
0x1f98   :  { %v2526_v53 = vpop.permute.xlu0 %2525 }
0x1f99   :  { %2528 = vst.msk [vmem:[#allocation3 + $0x8] sm:$0x3] %vm631_vm8, %v2526_v53  ;;  %4586 = vmatmul.mubr.msk.f32.vlgmr.msra.gmra.mrb[10].mxu1 %vm144_vm9, %v2526_v53 }
0x1f9a   :  { %4820 = vmatpush3.bf16.msra.mxu1 %v5052_v12  ;;  %4596 = vmatprep.mubr.msk.f32.mxu1 %vm4982_vm0, %v4983_v8 }
0x1f9b   :  { %4821 = vmatprep.subr.bf16.mxu1 %v4981_v2 }
0x1f9e   :  { %4823 = vmatpush3.bf16.msra.mxu1 %v5063_v15 }
0x1f9f   :  { %4830 = vmatprep.subr.bf16.mxu1 %v4981_v2 }
0x1fa1   :  { %4597 = vmatmul.mubr.msk.f32.vlgmr.msra.gmra.mrb[10].mxu1 %vm144_vm9, %v2604_v40 }
0x1fa2   :  { %4832 = vmatpush3.bf16.msra.mxu1 %v5028_v5  ;;  %4628 = vmatprep.mubr.msk.f32.mxu1 %vm4982_vm0, %v4983_v8 }
0x1fa3   :  { %4833 = vmatprep.subr.bf16.mxu1 %v4981_v2 }
0x1fa6   :  { %4835 = vmatpush3.bf16.msra.mxu1 %v5042_v9 }
0x1fa7   :  { %4836 = vmatprep.subr.bf16.mxu1 %v4981_v2 }
0x2074   :  { %v2673_v54 = vpop.f32.mrb[10].mxu1 }
0x2075   :  { %v4879_v55 = vadd.f32 %v2673_v54, %v5109_v42  ;;  %v4598_v56 = vpop.f32.mrb[11].mxu1 }
0x2077   :  { %v2678_v58 = vmax.f32 %v4879_v55, 0.0 }
0x2079   :  { %4602 = vmatmul.mubr.msk.f32.vlgmr.msra.gmra.mrb[32].mxu0 %vm71_vm3, %v2678_v58 }
0x207a   :  { %4826 = vmatpush3.bf16.msra.mxu0 %v5145_v20  ;;  %4612 = vmatprep.mubr.msk.f32.mxu0 %vm4982_vm0, %v4983_v8 }
0x207b   :  { %4827 = vmatprep.subr.bf16.mxu0 %v4981_v2 }
0x207e   :  { %4829 = vmatpush3.bf16.msra.mxu0 %v5151_v22 }
0x207f   :  { %4615 = vmatprep.subr.mxu0 %v4983_v8 }
0x2081   :  { %4613 = vmatmul.mubr.msk.f32.vlgmr.msra.gmra.mrb[34].mxu0 %vm144_vm9, %v2526_v53 }
0x2082   :  { %4616 = vmatpush3.msk.msra.mxu0 %vm525_vm5, %v5166_v31  ;;  %4617 = vmatprep.mubr.msk.f32.mxu0 %vm4982_vm0, %v4983_v8 }
0x2083   :  { %4642 = vmatprep.subr.mxu0 %v4983_v8 }
0x214c   :  { %v2748_v60 = vpop.f32.mrb[32].mxu0 }
0x214d   :  { %v2749_v62 = vadd.f32 %v5481_v61, %v2748_v60  ;;  %v4603_v0 = vpop.f32.mrb[33].mxu0 }
0x214f   :  { %v2752_v1 = vsel %vm368_vm4, %v2749_v62, -inf }
0x2150   :  { %2753 = vmax.xlane.f32.xlu0 %v2752_v1 }
0x2154   :  { %v2882_v3 = vpop.f32.mrb[34].mxu0 }
0x2155   :  { %v4614_v4 = vpop.f32.mrb[35].mxu0 }
0x21dd   :  { %v2754_v31 = vpop.xlane.xlu0 %2753 }
0x21de   :  { %v2755_v6 = vsub.f32 %v2749_v62, %v2754_v31 }
0x21e0   :  { %v2756_v46 = vmul.f32 1.442695, %v2755_v6 }
0x21e2   :  { %4950 = vpow2.f32 %v2756_v46 }
0x21ec   :  { %v4951_v7 = vpop.eup %4950 }
0x21ed   :  { %v2758_v11 = vsel %vm368_vm4, %v4951_v7, 0.0  ;;  %v2768_v13 = vrot.slane %v4951_v7, %v5122_v59 }
0x21ee   :  { %2759 = vadd.xlane.f32.xlu1 %v2758_v11 }
0x21ef   :  { %v2776_v14 = vrot.slane %v2768_v13, %v5122_v59  ;;  %v2769_v16 = vcombine.high %v2768_v13, %v2768_v13 }
0x21f1   :  { %v2787_v57 = vrot.slane %v2776_v14, %v5126_v63  ;;  %v2783_v19 = vrot.slane %v2769_v16, %v5122_v59 }
0x21f3   :  { %v2794_v23 = vmul.f32 %v5493_v21, %v2787_v57  ;;  %v2791_v24 = vrot.slane %v2783_v19, %v5126_v63 }
0x21f5   :  { %v2796_v26 = vsel %vm48_vm1, %v2794_v23, 0.0  ;;  %v2795_v17 = vmul.f32 %v5501_v28, %v2791_v24 }
0x21f6   :  { %2797 = vadd.xlane.f32.xlu0 %v2796_v26 }
0x21f7   :  { %v2799_v29 = vsel %vm48_vm1, %v2795_v17, 0.0 }
0x21fa   :  { %2800 = vadd.xlane.f32.xlu0 %v2799_v29 }
0x227b   :  { %v2760_v30 = vpop.xlane.xlu1 %2759 }
0x227c   :  { %4952 = vrcp.f32 %v2760_v30 }
0x2283   :  { %v2798_v32 = vpop.xlane.xlu0 %2797 }
0x2286   :  { %v4953_v18 = vpop.eup %4952 }
0x2287   :  { %v2807_v10 = vrot.slane %v4953_v18, %v5126_v63  ;;  %v2801_v33 = vpop.xlane.xlu0 %2800  ;;  %v2811_v34 = vrot.slane %v4953_v18, %v5159_v25 }
0x2289   :  { %v2814_v35 = vmul.f32 %v2807_v10, %v2798_v32  ;;  %v2815_v36 = vmul.f32 %v2811_v34, %v2801_v33 }
0x228b   :  { %2892 = vperm.xlu0 %4908, %v2815_v36   ;;  %2889 = vperm.xlu1 %4909, %v2814_v35  }
0x230a   :  { %v2893_v39 = vpop.permute.xlu0 %2892  ;;  %v2890_v41 = vpop.permute.xlu1 %2889 }
0x230b   :  { %v2901_v43 = vrot.slane %v2893_v39, %v5171_v37  ;;  %v2897_v45 = vrot.slane %v2890_v41, %v5171_v37 }
0x230d   :  { %v2902_v47 = vsel %vm69_vm2, %v2901_v43, %v2897_v45 }
0x230e   :  { %2997 = vst.msk [vmem:[#allocation2 + $0xa] sm:$0x3] %vm625_vm6, %v2902_v47  ;;  %4618 = vmatmul.mubr.msk.f32.vlgmr.msra.gmra.mrb[36].mxu0 %vm522_vm7, %v2902_v47 }
0x230f   :  { %4643 = vmatpush3.msra.mxu0 %v5515_v27  ;;  %4644 = vmatprep.mubr.msk.f32.mxu0 %vm4982_vm0, %v4983_v8 }
0x2310   :  { %4842 = vmatprep.subr.bf16.mxu0 %v4981_v2 }
0x23e1   :  { %v2971_v38 = vpop.f32.mrb[36].mxu0 }
0x23e2   :  { %v2972_v48 = vadd.f32 %v2971_v38, %v2882_v3  ;;  %v4619_v50 = vpop.f32.mrb[37].mxu0 }
0x23e4   :  { %v2975_v51 = vadd.f32 %v5185_v44, %v2972_v48 }
0x23e6   :  { %4954 = vtanh.f32 %v2975_v51 }
0x23f0   :  { %v4955_v52 = vpop.eup %4954 }
0x23f1   :  { %2981 = vrot.lane.b32.xlu1 %v4955_v52, %s4985_s8  ;;  %v2977_v53 = vadd.f32 1.0, %v4955_v52 }
0x23f3   :  { %v2978_v40 = vmul.f32 0.5, %v2977_v53 }
0x23f5   :  { %v2979_v56 = vmul.f32 %v2978_v40, %v5442_v49 }
0x2463   :  { %v2982_v54 = vpop.permute.xlu1 %2981 }
0x2464   :  { %v2984_v55 = vmul.f32 %v2982_v54, %v2978_v40 }
0x2466   :  { %2986 = vrot.lane.b32.xlu1 %v2984_v55, %s4986_s9 }
0x24d8   :  { %v2987_v58 = vpop.permute.xlu1 %2986 }
0x24d9   :  { %v5525_v60 = vadd.f32 %v2987_v58, %v2979_v56  ;;  %v5592_v58 = vld [vmem:[%s5685_s3 + $0x24] ss:$0 sm:$0xff] }
0x24db   :  { %4956 = vtanh.f32 %v5525_v60 }
0x24e5   :  { %v4957_v62 = vpop.eup %4956 }
0x24e6   :  { %2992 = vrot.lane.b32.xlu0 %v4957_v62, %s4985_s8 }
0x24ea   :  { %3077 = vrot.lane.b32.xlu0 %v5525_v60, %s4987_s10 }
0x2558   :  { %v2993_v44 = vpop.permute.xlu0 %2992 }
0x2559   :  { %v2995_v0 = vmul.f32 %v2993_v44, %v2978_v40 }
0x255b   :  { %2999 = vrot.lane.b32.xlu1 %v2995_v0, %s4986_s9 }
0x255c   :  { %v3078_v49 = vpop.permute.xlu0 %3077 }
0x25cd   :  { %v3000_v1 = vpop.permute.xlu1 %2999 }
0x25ce   :  { %3002 = vst.msk [vmem:[#allocation3 + $0xa] sm:$0x3] %vm631_vm8, %v3000_v1  ;;  %4629 = vmatmul.mubr.msk.f32.vlgmr.msra.gmra.mrb[12].mxu1 %vm144_vm9, %v3000_v1 }
0x25cf   :  { %4838 = vmatpush3.bf16.msra.mxu1 %v5052_v12  ;;  %4639 = vmatprep.mubr.msk.f32.mxu1 %vm4982_vm0, %v4983_v8 }
0x25d0   :  { %4839 = vmatprep.subr.bf16.mxu1 %v4981_v2 }
0x25d3   :  { %4841 = vmatpush3.bf16.msra.mxu1 %v5063_v15 }
0x25d4   :  { %4848 = vmatprep.subr.bf16.mxu1 %v4981_v2 }
0x25d6   :  { %4640 = vmatmul.mubr.msk.f32.vlgmr.msra.gmra.mrb[12].mxu1 %vm144_vm9, %v3078_v49 }
0x25d7   :  { %4850 = vmatpush3.bf16.msra.mxu1 %v5028_v5  ;;  %4671 = vmatprep.mubr.msk.f32.mxu1 %vm4982_vm0, %v4983_v8  ;;  %v5559_v5 = vld [vmem:[%s5685_s3 + $0x20] sm:$0xf] }
0x25d8   :  { %4851 = vmatprep.subr.bf16.mxu1 %v4981_v2 }
0x25db   :  { %4853 = vmatpush3.bf16.msra.mxu1 %v5042_v9 }
0x25dc   :  { %4854 = vmatprep.subr.bf16.mxu1 %v4981_v2 }
0x26a9   :  { %v3147_v3 = vpop.f32.mrb[12].mxu1 }
0x26aa   :  { %v4880_v4 = vadd.f32 %v3147_v3, %v5109_v42  ;;  %v4641_v31 = vpop.f32.mrb[13].mxu1 }
0x26ac   :  { %v3152_v6 = vmax.f32 %v4880_v4, 0.0 }
0x26ae   :  { %4645 = vmatmul.mubr.msk.f32.vlgmr.msra.gmra.mrb[38].mxu0 %vm71_vm3, %v3152_v6 }
0x26af   :  { %4844 = vmatpush3.bf16.msra.mxu0 %v5145_v20  ;;  %4655 = vmatprep.mubr.msk.f32.mxu0 %vm4982_vm0, %v4983_v8 }
0x26b0   :  { %4845 = vmatprep.subr.bf16.mxu0 %v4981_v2 }
0x26b3   :  { %4847 = vmatpush3.bf16.msra.mxu0 %v5151_v22 }
0x26b4   :  { %4658 = vmatprep.subr.mxu0 %v4983_v8 }
0x26b6   :  { %4656 = vmatmul.mubr.msk.f32.vlgmr.msra.gmra.mrb[40].mxu0 %vm144_vm9, %v3000_v1 }
0x26b7   :  { %4659 = vmatpush3.msk.msra.mxu0 %vm525_vm5, %v5559_v5  ;;  %4660 = vmatprep.mubr.msk.f32.mxu0 %vm4982_vm0, %v4983_v8 }
0x26b8   :  { %4685 = vmatprep.subr.mxu0 %v4983_v8 }
0x2781   :  { %v3222_v9 = vpop.f32.mrb[38].mxu0 }
0x2782   :  { %v3223_v46 = vadd.f32 %v5481_v61, %v3222_v9  ;;  %v4646_v7 = vpop.f32.mrb[39].mxu0 }
0x2784   :  { %v3226_v11 = vsel %vm368_vm4, %v3223_v46, -inf }
0x2785   :  { %3227 = vmax.xlane.f32.xlu1 %v3226_v11  ;;  %v3959_v11 = vld [vmem:[#allocation3] sm:$0xff] }
0x2789   :  { %v3356_v13 = vpop.f32.mrb[40].mxu0 }
0x278a   :  { %v4657_v14 = vpop.f32.mrb[41].mxu0 }
0x2812   :  { %v3228_v16 = vpop.xlane.xlu1 %3227 }
0x2813   :  { %v3229_v57 = vsub.f32 %v3223_v46, %v3228_v16 }
0x2815   :  { %v3230_v19 = vmul.f32 1.442695, %v3229_v57 }
0x2817   :  { %4958 = vpow2.f32 %v3230_v19 }
0x2821   :  { %v4959_v23 = vpop.eup %4958 }
0x2822   :  { %v3232_v24 = vsel %vm368_vm4, %v4959_v23, 0.0  ;;  %v3242_v26 = vrot.slane %v4959_v23, %v5122_v59 }
0x2823   :  { %3233 = vadd.xlane.f32.xlu0 %v3232_v24 }
0x2824   :  { %v3250_v17 = vrot.slane %v3242_v26, %v5122_v59  ;;  %v3243_v29 = vcombine.high %v3242_v26, %v3242_v26 }
0x2826   :  { %v3261_v30 = vrot.slane %v3250_v17, %v5126_v63  ;;  %v3257_v32 = vrot.slane %v3243_v29, %v5122_v59 }
0x2828   :  { %v3268_v18 = vmul.f32 %v5493_v21, %v3261_v30  ;;  %v3265_v10 = vrot.slane %v3257_v32, %v5126_v63 }
0x282a   :  { %v3270_v33 = vsel %vm48_vm1, %v3268_v18, 0.0  ;;  %v3269_v34 = vmul.f32 %v5501_v28, %v3265_v10 }
0x282b   :  { %3271 = vadd.xlane.f32.xlu0 %v3270_v33 }
0x282c   :  { %v3273_v35 = vsel %vm48_vm1, %v3269_v34, 0.0 }
0x282d   :  { %3274 = vadd.xlane.f32.xlu1 %v3273_v35 }
0x28b0   :  { %v3234_v36 = vpop.xlane.xlu0 %3233 }
0x28b1   :  { %4960 = vrcp.f32 %v3234_v36 }
0x28b8   :  { %v3272_v45 = vpop.xlane.xlu0 %3271 }
0x28ba   :  { %v3275_v47 = vpop.xlane.xlu1 %3274 }
0x28bb   :  { %v4961_v39 = vpop.eup %4960 }
0x28bc   :  { %v3281_v41 = vrot.slane %v4961_v39, %v5126_v63  ;;  %v3285_v43 = vrot.slane %v4961_v39, %v5159_v25 }
0x28be   :  { %v3288_v38 = vmul.f32 %v3281_v41, %v3272_v45  ;;  %v3289_v48 = vmul.f32 %v3285_v43, %v3275_v47 }
0x28c0   :  { %3366 = vperm.xlu1 %4909, %v3289_v48   ;;  %3363 = vperm.xlu0 %4908, %v3288_v38  }
0x293f   :  { %v3367_v50 = vpop.permute.xlu1 %3366  ;;  %v3364_v51 = vpop.permute.xlu0 %3363 }
0x2940   :  { %v3375_v52 = vrot.slane %v3367_v50, %v5171_v37  ;;  %v3371_v53 = vrot.slane %v3364_v51, %v5171_v37 }
0x2942   :  { %v3376_v40 = vsel %vm69_vm2, %v3375_v52, %v3371_v53 }
0x2943   :  { %3471 = vst.msk [vmem:[#allocation2 + $0xc] sm:$0x3] %vm625_vm6, %v3376_v40  ;;  %4661 = vmatmul.mubr.msk.f32.vlgmr.msra.gmra.mrb[42].mxu0 %vm522_vm7, %v3376_v40 }
0x2944   :  { %4686 = vmatpush3.msra.mxu0 %v5515_v27  ;;  %4687 = vmatprep.mubr.msk.f32.mxu0 %vm4982_vm0, %v4983_v8 }
0x2945   :  { %4860 = vmatprep.subr.bf16.mxu0 %v4981_v2 }
0x2a16   :  { %v3445_v54 = vpop.f32.mrb[42].mxu0 }
0x2a17   :  { %v3446_v55 = vadd.f32 %v3445_v54, %v3356_v13  ;;  %v4662_v56 = vpop.f32.mrb[43].mxu0 }
0x2a19   :  { %v3449_v62 = vadd.f32 %v5592_v58, %v3446_v55 }
0x2a1b   :  { %4962 = vtanh.f32 %v3449_v62 }
0x2a25   :  { %v4963_v44 = vpop.eup %4962 }
0x2a26   :  { %3455 = vrot.lane.b32.xlu1 %v4963_v44, %s4985_s8  ;;  %v3451_v27 = vadd.f32 1.0, %v4963_v44 }
0x2a28   :  { %v3452_v0 = vmul.f32 0.5, %v3451_v27 }
0x2a2a   :  { %v3453_v3 = vmul.f32 %v3452_v0, %v5525_v60 }
0x2a98   :  { %v3456_v1 = vpop.permute.xlu1 %3455 }
0x2a99   :  { %v3458_v49 = vmul.f32 %v3456_v1, %v3452_v0 }
0x2a9b   :  { %3460 = vrot.lane.b32.xlu0 %v3458_v49, %s4986_s9 }
0x2b0d   :  { %v3461_v4 = vpop.permute.xlu0 %3460 }
0x2b0e   :  { %v5598_v31 = vadd.f32 %v3461_v4, %v3453_v3 }
0x2b10   :  { %4964 = vtanh.f32 %v5598_v31 }
0x2b1a   :  { %v4965_v6 = vpop.eup %4964 }
0x2b1b   :  { %3466 = vrot.lane.b32.xlu1 %v4965_v6, %s4985_s8  ;;  %v3952_v6 = vld [vmem:[%s5686_s4 + $0x8] sm:$0xff] }
0x2b1f   :  { %3551 = vrot.lane.b32.xlu1 %v5598_v31, %s4987_s10 }
0x2b8d   :  { %v3467_v9 = vpop.permute.xlu1 %3466 }
0x2b8e   :  { %v3469_v46 = vmul.f32 %v3467_v9, %v3452_v0 }
0x2b90   :  { %3473 = vrot.lane.b32.xlu0 %v3469_v46, %s4986_s9  ;;  %v3953_v46 = vld [vmem:[%s5686_s4 + $0x10] sm:$0xff] }
0x2b91   :  { %v3552_v60 = vpop.permute.xlu1 %3551 }
0x2c02   :  { %v3474_v7 = vpop.permute.xlu0 %3473 }
0x2c03   :  { %3476 = vst.msk [vmem:[#allocation3 + $0xc] sm:$0x3] %vm631_vm8, %v3474_v7  ;;  %4672 = vmatmul.mubr.msk.f32.vlgmr.msra.gmra.mrb[14].mxu1 %vm144_vm9, %v3474_v7 }
0x2c04   :  { %4856 = vmatpush3.bf16.msra.mxu1 %v5052_v12  ;;  %4682 = vmatprep.mubr.msk.f32.mxu1 %vm4982_vm0, %v4983_v8 }
0x2c05   :  { %4857 = vmatprep.subr.bf16.mxu1 %v4981_v2 }
0x2c08   :  { %4859 = vmatpush3.bf16.msra.mxu1 %v5063_v15 }
0x2c0b   :  { %4683 = vmatmul.mubr.msk.f32.vlgmr.msra.gmra.mrb[14].mxu1 %vm144_vm9, %v3552_v60 }
0x2c0c   :  { %4714 = vmatprep.mubr.msk.f32.mxu1 %vm144_vm9, %v3959_v11 }
0x2cde   :  { %v3621_v13 = vpop.f32.mrb[14].mxu1 }
0x2cdf   :  { %v4881_v14 = vadd.f32 %v3621_v13, %v5109_v42  ;;  %v4684_v16 = vpop.f32.mrb[15].mxu1 }
0x2ce0   :  { %v4193_v16 = vld [vmem:[%s5686_s4 + $0x24] ss:$0 sm:$0xff] }
0x2ce1   :  { %v3626_v57 = vmax.f32 %v4881_v14, 0.0 }
0x2ce3   :  { %4688 = vmatmul.mubr.msk.f32.vlgmr.msra.gmra.mrb[44].mxu0 %vm71_vm3, %v3626_v57 }
0x2ce4   :  { %4862 = vmatpush3.bf16.msra.mxu0 %v5145_v20  ;;  %4698 = vmatprep.mubr.msk.f32.mxu0 %vm4982_vm0, %v4983_v8 }
0x2ce5   :  { %4863 = vmatprep.subr.bf16.mxu0 %v4981_v2 }
0x2ce8   :  { %4865 = vmatpush3.bf16.msra.mxu0 %v5151_v22 }
0x2ce9   :  { %4701 = vmatprep.subr.mxu0 %v4983_v8 }
0x2ceb   :  { %4699 = vmatmul.mubr.msk.f32.vlgmr.msra.gmra.mrb[46].mxu0 %vm144_vm9, %v3474_v7 }
0x2cec   :  { %4702 = vmatpush3.msk.msra.mxu0 %vm525_vm5, %v5559_v5  ;;  %4703 = vmatprep.mubr.msk.f32.mxu0 %vm4982_vm0, %v4983_v8 }
0x2db6   :  { %v3696_v12 = vpop.f32.mrb[44].mxu0 }
0x2db7   :  { %v3697_v15 = vadd.f32 %v5481_v61, %v3696_v12  ;;  %v4689_v42 = vpop.f32.mrb[45].mxu0 }
0x2db9   :  { %v3700_v20 = vsel %vm368_vm4, %v3697_v15, -inf }
0x2dba   :  { %3701 = vmax.xlane.f32.xlu0 %v3700_v20 }
0x2dbe   :  { %v3830_v2 = vpop.f32.mrb[46].mxu0 }
0x2dbf   :  { %v4700_v19 = vpop.f32.mrb[47].mxu0 }
0x2e47   :  { %v3702_v22 = vpop.xlane.xlu0 %3701 }
0x2e48   :  { %v3703_v23 = vsub.f32 %v3697_v15, %v3702_v22 }
0x2e4a   :  { %v3704_v24 = vmul.f32 1.442695, %v3703_v23 }
0x2e4c   :  { %4966 = vpow2.f32 %v3704_v24 }
0x2e56   :  { %v4967_v26 = vpop.eup %4966 }
0x2e57   :  { %v3706_v17 = vsel %vm368_vm4, %v4967_v26, 0.0  ;;  %v3716_v5 = vrot.slane %v4967_v26, %v5122_v59 }
0x2e58   :  { %3707 = vadd.xlane.f32.xlu1 %v3706_v17 }
0x2e59   :  { %v3724_v8 = vrot.slane %v3716_v5, %v5122_v59  ;;  %v3717_v29 = vcombine.high %v3716_v5, %v3716_v5 }
0x2e5b   :  { %v3735_v61 = vrot.slane %v3724_v8, %v5126_v63  ;;  %v3731_v30 = vrot.slane %v3717_v29, %v5122_v59 }
0x2e5d   :  { %v3742_v32 = vmul.f32 %v5493_v21, %v3735_v61  ;;  %v3739_v18 = vrot.slane %v3731_v30, %v5126_v63 }
0x2e5f   :  { %v3744_v10 = vsel %vm48_vm1, %v3742_v32, 0.0  ;;  %v3743_v33 = vmul.f32 %v5501_v28, %v3739_v18  ;;  %v3955_v28 = vld [vmem:[%s5686_s4 + $0x20] sm:$0xf] }
0x2e60   :  { %3745 = vadd.xlane.f32.xlu0 %v3744_v10  ;;  %4717 = vmatprep.subr.msk.mxu0 %vm525_vm5, %v3955_v28 }
0x2e61   :  { %v3747_v34 = vsel %vm48_vm1, %v3743_v33, 0.0 }
0x2e64   :  { %3748 = vadd.xlane.f32.xlu0 %v3747_v34 }
0x2ee5   :  { %v3708_v35 = vpop.xlane.xlu1 %3707 }
0x2ee6   :  { %4968 = vrcp.f32 %v3708_v35 }
0x2eed   :  { %v3746_v36 = vpop.xlane.xlu0 %3745 }
0x2ef0   :  { %v4969_v39 = vpop.eup %4968 }
0x2ef1   :  { %v3755_v41 = vrot.slane %v4969_v39, %v5126_v63  ;;  %v3749_v43 = vpop.xlane.xlu0 %3748  ;;  %v3759_v59 = vrot.slane %v4969_v39, %v5159_v25  ;;  %v3957_v25 = vld [vmem:[#allocation2] sm:$0xff] }
0x2ef3   :  { %v3762_v21 = vmul.f32 %v3755_v41, %v3746_v36  ;;  %v3763_v45 = vmul.f32 %v3759_v59, %v3749_v43 }
0x2ef5   :  { %3840 = vperm.xlu0 %4908, %v3763_v45   ;;  %3837 = vperm.xlu1 %4909, %v3762_v21  }
0x2f74   :  { %v3841_v47 = vpop.permute.xlu0 %3840  ;;  %v3838_v38 = vpop.permute.xlu1 %3837 }
0x2f75   :  { %v3849_v48 = vrot.slane %v3841_v47, %v5171_v37  ;;  %v3845_v50 = vrot.slane %v3838_v38, %v5171_v37 }
0x2f77   :  { %v3850_v63 = vsel %vm69_vm2, %v3849_v48, %v3845_v50 }
0x2f78   :  { %3945 = vst.msk [vmem:[#allocation2 + $0xe] sm:$0x3] %vm625_vm6, %v3850_v63  ;;  %4704 = vmatmul.mubr.msk.f32.vlgmr.msra.gmra.mrb[48].mxu0 %vm522_vm7, %v3850_v63 }
0x2f79   :  { %4719 = vmatprep.mubr.msk.f32.mxu0 %vm522_vm7, %v3957_v25  ;;  %4718 = vmatpush3.msk.msra.mxu0 %vm525_vm5, %v3955_v28 }
0x2f7f   :  { %v3958_v51 = vld [vmem:[#allocation2 + $0x8] sm:$0xff] }
0x2f80   :  { %4720 = vmatmul.mubr.msk.f32.vlgmr.msra.gmra.mrb[50].mxu0 %vm522_vm7, %v3958_v51 }
0x304b   :  { %v3919_v52 = vpop.f32.mrb[48].mxu0 }
0x304c   :  { %v3920_v53 = vadd.f32 %v3919_v52, %v3830_v2  ;;  %v4705_v40 = vpop.f32.mrb[49].mxu0 }
0x304e   :  { %v3923_v54 = vadd.f32 %v5592_v58, %v3920_v53  ;;  %v3951_v58 = vld [vmem:[%s5686_s4] sm:$0xff] }
0x304f   :  { %v4866_v9 = vpack.c.bf16 %v3952_v6, %v3951_v58 }
0x3050   :  { %4970 = vtanh.f32 %v3923_v54 }
0x3051   :  { %4867 = vmatprep.subr.bf16.mxu1 %v4866_v9 }
0x3052   :  { %4869 = vmatpush3.bf16.msra.mxu1 %v4866_v9 }
0x3053   :  { %v4721_v37 = vpop.f32.mrb[50].mxu0 }
0x3054   :  { %v4117_v55 = vpop.f32.mrb[51].mxu0 }
0x305a   :  { %v4971_v56 = vpop.eup %4970 }
0x305b   :  { %3929 = vrot.lane.b32.xlu1 %v4971_v56, %s4985_s8  ;;  %v3925_v62 = vadd.f32 1.0, %v4971_v56 }
0x305d   :  { %v3926_v44 = vmul.f32 0.5, %v3925_v62 }
0x305f   :  { %v3927_v1 = vmul.f32 %v3926_v44, %v5598_v31  ;;  %v3954_v31 = vld [vmem:[%s5686_s4 + $0x18] sm:$0xff] }
0x3060   :  { %v4870_v7 = vpack.c.bf16 %v3954_v31, %v3953_v46 }
0x3062   :  { %4871 = vmatprep.subr.bf16.mxu1 %v4870_v7 }
0x3063   :  { %4873 = vmatpush3.bf16.msra.mxu1 %v4870_v7 }
0x30cd   :  { %v3930_v27 = vpop.permute.xlu1 %3929 }
0x30ce   :  { %v3932_v0 = vmul.f32 %v3930_v27, %v3926_v44 }
0x30d0   :  { %3934 = vrot.lane.b32.xlu1 %v3932_v0, %s4986_s9 }
0x3142   :  { %v3935_v49 = vpop.permute.xlu1 %3934 }
0x3143   :  { %v3937_v3 = vadd.f32 %v3935_v49, %v3927_v1 }
0x3145   :  { %4972 = vtanh.f32 %v3937_v3 }
0x314f   :  { %v4973_v4 = vpop.eup %4972 }
0x3150   :  { %3940 = vrot.lane.b32.xlu0 %v4973_v4, %s4985_s8 }
0x31c2   :  { %v3941_v60 = vpop.permute.xlu0 %3940 }
0x31c3   :  { %v3943_v11 = vmul.f32 %v3941_v60, %v3926_v44 }
0x31c5   :  { %3947 = vrot.lane.b32.xlu1 %v3943_v11, %s4986_s9 }
0x3237   :  { %v3948_v13 = vpop.permute.xlu1 %3947 }
0x3238   :  { %3950 = vst.msk [vmem:[#allocation3 + $0xe] sm:$0x3] %vm631_vm8, %v3948_v13 }
0x323f   :  { %v3960_v14 = vld [vmem:[#allocation3 + $0x8] sm:$0xff] }
0x3240   :  { %4715 = vmatmul.mubr.msk.f32.vlgmr.msra.gmra.mrb[16].mxu1 %vm144_vm9, %v3960_v14 }
0x3313   :  { %v4716_v57 = vpop.f32.mrb[16].mxu1 }
0x3314   :  { %v4123_v12 = vadd.f32 %v4721_v37, %v4716_v57  ;;  %v4033_v15 = vpop.f32.mrb[17].mxu1 }
0x3315   :  { %v4118_v42 = vadd.f32 %v4117_v55, %v4033_v15 }
0x3316   :  { %v4131_v20 = vadd.f32 %v4193_v16, %v4123_v12 }
0x3317   :  { %v4130_v2 = vadd.f32 %v4193_v16, %v4118_v42 }
0x3318   :  { %4134 = vst.msk [vmem:[%s5687_s5 + $0x8] sm:$0xff] %vm4132_vm10, %v4131_v20 }
0x3319   :  { %4133 = vst.msk [vmem:[%s5687_s5] sm:$0xff] %vm4132_vm10, %v4130_v2 }

</bundles_post_ra>
